<compile_context>
chip_gen: v7x
topology: tpu7x:2x2x1
jax: 0.10.0
libtpu: 0.0.40
codegen_flags: <defaults>
</compile_context>

<pallas_src>
import functools

import jax
import jax.numpy as jnp
import numpy as np
from jax.experimental import pallas as pl
from jax.experimental.pallas import tpu as pltpu


# ----------------------------------------------------------------------------
# Fused kernel (one batch element per grid step).
#   x_ref:   (1, H, W, Cin)      f32   input tile (NHWC)
#   s1,b1:   (1, Cin)            f32   folded BN1 scale/shift
#   w1:      (Cin, Cmid)         bf16  1x1 conv weight with BN2 scale folded in
#   b2:      (1, Cmid)           f32   folded (conv1 bias + BN2) shift
#   w3:      (3, 3, Cmid, Cout)  bf16  3x3 conv weight
#   b3:      (1, Cout)           f32   3x3 conv bias
#   o_ref:   (1, H, W, Cout)     f32   output tile (NHWC)
#   mid_ref: (H+2, W+2, Cmid)    f32   VMEM scratch holding the zero-padded intermediate
# ----------------------------------------------------------------------------
def _dense_layer_kernel(x_ref, s1_ref, b1_ref, w1_ref, b2_ref, w3_ref, b3_ref,
                        o_ref, mid_ref, *, H, W, Cout, stripe_rows):
    f32 = jnp.float32

    # ---- Stage 1: BN1 + ReLU (f32 VPU), 1x1 conv as matmul (bf16 MXU operands,
    #      f32 accumulation), folded conv-bias+BN2 shift, ReLU. -------------------
    y = jnp.maximum(x_ref[0] * s1_ref[...] + b1_ref[...], 0.0)            # (H, W, Cin)
    z = jax.lax.dot_general(y.astype(jnp.bfloat16), w1_ref[...],
                            (((2,), (0,)), ((), ())),
                            preferred_element_type=f32)                   # (H, W, Cmid)
    z = jnp.maximum(z + b2_ref[...], 0.0)

    # ---- Intermediate lives only in VMEM: zero-padded scratch, no HBM round trip.
    mid_ref[...] = jnp.zeros_like(mid_ref)
    mid_ref[1:H + 1, 1:W + 1, :] = z

    w3 = w3_ref[...]            # (3, 3, Cmid, Cout) bf16
    b3 = b3_ref[...]            # (1, Cout) f32

    # ---- Stage 2: 3x3 conv, padding=1, as 9 shifted matmuls, accumulated per
    #      H-stripe so the f32 accumulator stays small (a few vregs). -------------
    for s in range(H // stripe_rows):
        r0 = s * stripe_rows
        acc = jnp.zeros((stripe_rows, W, Cout), f32)
        for dy in range(3):
            # Leading-dim slice of the scratch: cheap (no sublane relayout).
            slab = mid_ref[r0 + dy:r0 + dy + stripe_rows, :, :]           # (rows, W+2, Cmid)
            for dx in range(3):
                tap = slab[:, dx:dx + W, :].astype(jnp.bfloat16)          # (rows, W, Cmid)
                acc = acc + jax.lax.dot_general(
                    tap, w3[dy, dx], (((2,), (0,)), ((), ())),
                    preferred_element_type=f32)
        o_ref[0, r0:r0 + stripe_rows, :, :] = acc + b3


# ----------------------------------------------------------------------------
# Parameter construction + full forward
# ----------------------------------------------------------------------------
def init_params(key, in_channels, growth_rate, F):
    cmid = F * growth_rate
    cout = growth_rate
    ks = jax.random.split(key, 12)
    eps = 1e-5
    p = dict(
        bn1_gamma=jax.random.normal(ks[0], (in_channels,)) * 0.1 + 1.0,
        bn1_beta=jax.random.normal(ks[1], (in_channels,)) * 0.1,
        bn1_mean=jax.random.normal(ks[2], (in_channels,)) * 0.1,
        bn1_var=jnp.abs(jax.random.normal(ks[3], (in_channels,))) * 0.1 + 0.5,
        w1=jax.random.normal(ks[4], (cmid, in_channels)) * 0.2,   # PyTorch (Cmid,Cin,1,1)
        b1=jax.random.normal(ks[5], (cmid,)) * 0.1,
        bn2_gamma=jax.random.normal(ks[6], (cmid,)) * 0.1 + 1.0,
        bn2_beta=jax.random.normal(ks[7], (cmid,)) * 0.1,
        bn2_mean=jax.random.normal(ks[8], (cmid,)) * 0.1,
        bn2_var=jnp.abs(jax.random.normal(ks[9], (cmid,))) * 0.1 + 0.5,
        w3=jax.random.normal(ks[10], (cout, cmid, 3, 3)) * 0.1,   # PyTorch (Cout,Cmid,3,3)
        b3=jax.random.normal(ks[11], (cout,)) * 0.1,
        eps=eps,
    )
    return {k: (v.astype(jnp.float32) if isinstance(v, jnp.ndarray) else v) for k, v in p.items()}


def dense_layer_forward(x_nchw, p, *, stripe_rows=8):
    N, Cin, H, W = x_nchw.shape
    x = jnp.transpose(x_nchw, (0, 2, 3, 1)).astype(jnp.float32)   # NCHW -> NHWC

    # Fold BN1 into per-channel scale/shift (f32).
    s1 = p["bn1_gamma"] / jnp.sqrt(p["bn1_var"] + p["eps"])
    b1 = p["bn1_beta"] - p["bn1_mean"] * s1
    # Fold conv1 bias + BN2 into shift; fold BN2 scale s2 into the 1x1 weight.
    s2 = p["bn2_gamma"] / jnp.sqrt(p["bn2_var"] + p["eps"])
    b2 = p["bn2_beta"] - p["bn2_mean"] * s2 + p["b1"] * s2

    w1 = jnp.transpose(p["w1"], (1, 0)) * s2[None, :]             # (Cin, Cmid), s2 folded
    w3 = jnp.transpose(p["w3"], (2, 3, 1, 0))                     # (3, 3, Cmid, Cout)
    Cmid = w1.shape[1]
    Cout = w3.shape[-1]

    if H % stripe_rows != 0:
        stripe_rows = H                                           # fallback for odd H

    kernel = functools.partial(_dense_layer_kernel, H=H, W=W, Cout=Cout,
                               stripe_rows=stripe_rows)
    out = pl.pallas_call(
        kernel,
        out_shape=jax.ShapeDtypeStruct((N, H, W, Cout), jnp.float32),
        grid_spec=pltpu.PrefetchScalarGridSpec(
            num_scalar_prefetch=0,
            grid=(N,),
            in_specs=[
                pl.BlockSpec((1, H, W, Cin), lambda n: (n, 0, 0, 0)),
                pl.BlockSpec((1, Cin), lambda n: (0, 0)),
                pl.BlockSpec((1, Cin), lambda n: (0, 0)),
                pl.BlockSpec((Cin, Cmid), lambda n: (0, 0)),
                pl.BlockSpec((1, Cmid), lambda n: (0, 0)),
                pl.BlockSpec((3, 3, Cmid, Cout), lambda n: (0, 0, 0, 0)),
                pl.BlockSpec((1, Cout), lambda n: (0, 0)),
            ],
            out_specs=pl.BlockSpec((1, H, W, Cout), lambda n: (n, 0, 0, 0)),
            scratch_shapes=[pltpu.VMEM((H + 2, W + 2, Cmid), jnp.float32)],
        ),
        compiler_params=pltpu.CompilerParams(
            dimension_semantics=("parallel",),
            vmem_limit_bytes=32 * 1024 * 1024,      # fits v5e/v6e/v7x scoped VMEM budgets
        ),
    )(x, s1[None, :], b1[None, :], w1.astype(jnp.bfloat16),
      b2[None, :], w3.astype(jnp.bfloat16), p["b3"][None, :])

    # Dropout2d: inference-mode identity.
    return jnp.transpose(out, (0, 3, 1, 2))                       # NHWC -> NCHW


# Pure-JAX f32 reference (same math, no Pallas) for a correctness check.
def reference_forward(x_nchw, p):
    x = jnp.transpose(x_nchw, (0, 2, 3, 1)).astype(jnp.float32)
    s1 = p["bn1_gamma"] / jnp.sqrt(p["bn1_var"] + p["eps"])
    b1 = p["bn1_beta"] - p["bn1_mean"] * s1
    y = jnp.maximum(x * s1 + b1, 0.0)
    z = jnp.einsum("nhwc,fc->nhwf", y, p["w1"]) + p["b1"]
    s2 = p["bn2_gamma"] / jnp.sqrt(p["bn2_var"] + p["eps"])
    b2 = p["bn2_beta"] - p["bn2_mean"] * s2
    z = jnp.maximum(z * s2 + b2, 0.0)
    zp = jnp.pad(z, ((0, 0), (1, 1), (1, 1), (0, 0)))
    N, H, W, _ = z.shape
    cout = p["w3"].shape[0]
    acc = jnp.zeros((N, H, W, cout), jnp.float32)
    for dy in range(3):
        for dx in range(3):
            acc = acc + jnp.einsum("nhwc,fc->nhwf",
                                   zp[:, dy:dy + H, dx:dx + W, :], p["w3"][:, :, dy, dx])
    acc = acc + p["b3"]
    return jnp.transpose(acc, (0, 3, 1, 2))


if __name__ == "__main__":
    N, Cin, H, W = 2, 4, 16, 16
    growth_rate, F = 8, 2   # small synthetic sizes; Cmid = F*growth = 16, Cout = 8

    key = jax.random.PRNGKey(0)
    kx, kp = jax.random.split(key)
    x = jax.random.normal(kx, (N, Cin, H, W), dtype=jnp.float32)
    params = init_params(kp, Cin, growth_rate, F)

    out = dense_layer_forward(x, params)
    out = jax.block_until_ready(out)

    ref = jax.block_until_ready(reference_forward(x, params))
    assert out.shape == (N, growth_rate, H, W), out.shape
    # bf16 MXU operands (f32 accumulation) -> loosened tolerance vs the f32 reference.
    np.testing.assert_allclose(np.asarray(out), np.asarray(ref), rtol=3e-2, atol=3e-2)

    print("KERNEL_OK")
</pallas_src>

<mosaic_0001>
module attributes {stable_mosaic.version = 11 : i64} {
  func.func @_dense_layer_kernel(%arg0: i32, %arg1: memref<1x16x16x4xf32, #tpu.memory_space<vmem>>, %arg2: memref<1x4xf32, #tpu.memory_space<vmem>>, %arg3: memref<1x4xf32, #tpu.memory_space<vmem>>, %arg4: memref<4x16xbf16, #tpu.memory_space<vmem>>, %arg5: memref<1x16xf32, #tpu.memory_space<vmem>>, %arg6: memref<3x3x16x8xbf16, #tpu.memory_space<vmem>>, %arg7: memref<1x8xf32, #tpu.memory_space<vmem>>, %arg8: memref<1x16x16x8xf32, #tpu.memory_space<vmem>>, %arg9: memref<18x18x16xf32, #tpu.memory_space<vmem>>) attributes {dimension_semantics = [#tpu.dimension_semantics<parallel>], iteration_bounds = array<i64: 2>, scalar_prefetch = 0 : i64, scratch_operands = 1 : i64, tpu.core_type = #tpu.core_type<tc>, window_params = [{transform_indices = @transform_0, window_bounds = array<i64: 1, 16, 16, 4>}, {pipeline_mode = #tpu.pipeline_mode<synchronous>, transform_indices = @transform_1, window_bounds = array<i64: 1, 4>}, {pipeline_mode = #tpu.pipeline_mode<synchronous>, transform_indices = @transform_2, window_bounds = array<i64: 1, 4>}, {pipeline_mode = #tpu.pipeline_mode<synchronous>, transform_indices = @transform_3, window_bounds = array<i64: 4, 16>}, {pipeline_mode = #tpu.pipeline_mode<synchronous>, transform_indices = @transform_4, window_bounds = array<i64: 1, 16>}, {pipeline_mode = #tpu.pipeline_mode<synchronous>, transform_indices = @transform_5, window_bounds = array<i64: 3, 3, 16, 8>}, {pipeline_mode = #tpu.pipeline_mode<synchronous>, transform_indices = @transform_6, window_bounds = array<i64: 1, 8>}, {transform_indices = @transform_7, window_bounds = array<i64: 1, 16, 16, 8>}]} {
    %c0 = arith.constant 0 : index
    %c0_0 = arith.constant 0 : index
    %c0_1 = arith.constant 0 : index
    %c0_2 = arith.constant 0 : index
    %0 = vector.load %arg1[%c0, %c0_0, %c0_1, %c0_2] : memref<1x16x16x4xf32, #tpu.memory_space<vmem>>, vector<1x16x16x4xf32>
    %1 = vector.shape_cast %0 : vector<1x16x16x4xf32> to vector<16x16x4xf32>
    %c0_3 = arith.constant 0 : index
    %c0_4 = arith.constant 0 : index
    %2 = vector.load %arg2[%c0_3, %c0_4] : memref<1x4xf32, #tpu.memory_space<vmem>>, vector<1x4xf32>
    %3 = vector.shape_cast %2 : vector<1x4xf32> to vector<1x1x4xf32>
    %4 = vector.broadcast %3 : vector<1x1x4xf32> to vector<16x16x4xf32>
    %5 = arith.mulf %1, %4 : vector<16x16x4xf32>
    %c0_5 = arith.constant 0 : index
    %c0_6 = arith.constant 0 : index
    %6 = vector.load %arg3[%c0_5, %c0_6] : memref<1x4xf32, #tpu.memory_space<vmem>>, vector<1x4xf32>
    %7 = vector.shape_cast %6 : vector<1x4xf32> to vector<1x1x4xf32>
    %8 = vector.broadcast %7 : vector<1x1x4xf32> to vector<16x16x4xf32>
    %9 = arith.addf %5, %8 : vector<16x16x4xf32>
    %cst = arith.constant 0.000000e+00 : f32
    %10 = vector.broadcast %cst : f32 to vector<16x16x4xf32>
    %11 = arith.maximumf %9, %10 : vector<16x16x4xf32>
    %12 = arith.truncf %11 : vector<16x16x4xf32> to vector<16x16x4xbf16>
    %c0_7 = arith.constant 0 : index
    %c0_8 = arith.constant 0 : index
    %13 = vector.load %arg4[%c0_7, %c0_8] : memref<4x16xbf16, #tpu.memory_space<vmem>>, vector<4x16xbf16>
    %cst_9 = arith.constant dense<0.000000e+00> : vector<16x16x16xf32>
    %14 = tpu.matmul %12, %13, %cst_9 {dimension_numbers = #tpu.dot_dimension_numbers<[2], [0], [0, 1], [1], [0, 0, 0, 1, 1, 1], [], []>} : vector<16x16x4xbf16>, vector<4x16xbf16>, vector<16x16x16xf32> -> vector<16x16x16xf32>
    %c0_10 = arith.constant 0 : index
    %c0_11 = arith.constant 0 : index
    %15 = vector.load %arg5[%c0_10, %c0_11] : memref<1x16xf32, #tpu.memory_space<vmem>>, vector<1x16xf32>
    %16 = vector.shape_cast %15 : vector<1x16xf32> to vector<1x1x16xf32>
    %17 = vector.broadcast %16 : vector<1x1x16xf32> to vector<16x16x16xf32>
    %18 = arith.addf %14, %17 : vector<16x16x16xf32>
    %cst_12 = arith.constant 0.000000e+00 : f32
    %19 = vector.broadcast %cst_12 : f32 to vector<16x16x16xf32>
    %20 = arith.maximumf %18, %19 : vector<16x16x16xf32>
    %cst_13 = arith.constant 0.000000e+00 : f32
    %21 = vector.broadcast %cst_13 : f32 to vector<18x18x16xf32>
    %c0_14 = arith.constant 0 : index
    %c0_15 = arith.constant 0 : index
    %c0_16 = arith.constant 0 : index
    %22 = vector.load %arg9[%c0_14, %c0_15, %c0_16] : memref<18x18x16xf32, #tpu.memory_space<vmem>>, vector<18x18x16xf32>
    tpu.vector_store %arg9[%c0_14, %c0_15, %c0_16], %21 {strides = array<i32>} : memref<18x18x16xf32, #tpu.memory_space<vmem>>, vector<18x18x16xf32>,
    %c1 = arith.constant 1 : index
    %c1_17 = arith.constant 1 : index
    %c0_18 = arith.constant 0 : index
    %23 = vector.load %arg9[%c1, %c1_17, %c0_18] : memref<18x18x16xf32, #tpu.memory_space<vmem>>, vector<16x16x16xf32>
    tpu.vector_store %arg9[%c1, %c1_17, %c0_18], %20 {strides = array<i32>} : memref<18x18x16xf32, #tpu.memory_space<vmem>>, vector<16x16x16xf32>,
    %c0_19 = arith.constant 0 : index
    %c0_20 = arith.constant 0 : index
    %c0_21 = arith.constant 0 : index
    %c0_22 = arith.constant 0 : index
    %24 = vector.load %arg6[%c0_19, %c0_20, %c0_21, %c0_22] : memref<3x3x16x8xbf16, #tpu.memory_space<vmem>>, vector<3x3x16x8xbf16>
    %c0_23 = arith.constant 0 : index
    %c0_24 = arith.constant 0 : index
    %25 = vector.load %arg7[%c0_23, %c0_24] : memref<1x8xf32, #tpu.memory_space<vmem>>, vector<1x8xf32>
    %cst_25 = arith.constant 0.000000e+00 : f32
    %26 = vector.broadcast %cst_25 : f32 to vector<8x16x8xf32>
    %c0_26 = arith.constant 0 : index
    %c0_27 = arith.constant 0 : index
    %c0_28 = arith.constant 0 : index
    %27 = vector.load %arg9[%c0_26, %c0_27, %c0_28] : memref<18x18x16xf32, #tpu.memory_space<vmem>>, vector<8x18x16xf32>
    %28 = vector.extract_strided_slice %27 {offsets = [0, 0, 0], sizes = [8, 16, 16], strides = [1, 1, 1]} : vector<8x18x16xf32> to vector<8x16x16xf32>
    %29 = arith.truncf %28 : vector<8x16x16xf32> to vector<8x16x16xbf16>
    %30 = vector.extract_strided_slice %24 {offsets = [0, 0, 0, 0], sizes = [1, 1, 16, 8], strides = [1, 1, 1, 1]} : vector<3x3x16x8xbf16> to vector<1x1x16x8xbf16>
    %31 = vector.shape_cast %30 : vector<1x1x16x8xbf16> to vector<16x8xbf16>
    %cst_29 = arith.constant dense<0.000000e+00> : vector<8x16x8xf32>
    %32 = tpu.matmul %29, %31, %cst_29 {dimension_numbers = #tpu.dot_dimension_numbers<[2], [0], [0, 1], [1], [0, 0, 0, 1, 1, 1], [], []>} : vector<8x16x16xbf16>, vector<16x8xbf16>, vector<8x16x8xf32> -> vector<8x16x8xf32>
    %33 = arith.addf %26, %32 : vector<8x16x8xf32>
    %34 = vector.extract_strided_slice %27 {offsets = [0, 1, 0], sizes = [8, 16, 16], strides = [1, 1, 1]} : vector<8x18x16xf32> to vector<8x16x16xf32>
    %35 = arith.truncf %34 : vector<8x16x16xf32> to vector<8x16x16xbf16>
    %36 = vector.extract_strided_slice %24 {offsets = [0, 1, 0, 0], sizes = [1, 1, 16, 8], strides = [1, 1, 1, 1]} : vector<3x3x16x8xbf16> to vector<1x1x16x8xbf16>
    %37 = vector.shape_cast %36 : vector<1x1x16x8xbf16> to vector<16x8xbf16>
    %cst_30 = arith.constant dense<0.000000e+00> : vector<8x16x8xf32>
    %38 = tpu.matmul %35, %37, %cst_30 {dimension_numbers = #tpu.dot_dimension_numbers<[2], [0], [0, 1], [1], [0, 0, 0, 1, 1, 1], [], []>} : vector<8x16x16xbf16>, vector<16x8xbf16>, vector<8x16x8xf32> -> vector<8x16x8xf32>
    %39 = arith.addf %33, %38 : vector<8x16x8xf32>
    %40 = vector.extract_strided_slice %27 {offsets = [0, 2, 0], sizes = [8, 16, 16], strides = [1, 1, 1]} : vector<8x18x16xf32> to vector<8x16x16xf32>
    %41 = arith.truncf %40 : vector<8x16x16xf32> to vector<8x16x16xbf16>
    %42 = vector.extract_strided_slice %24 {offsets = [0, 2, 0, 0], sizes = [1, 1, 16, 8], strides = [1, 1, 1, 1]} : vector<3x3x16x8xbf16> to vector<1x1x16x8xbf16>
    %43 = vector.shape_cast %42 : vector<1x1x16x8xbf16> to vector<16x8xbf16>
    %cst_31 = arith.constant dense<0.000000e+00> : vector<8x16x8xf32>
    %44 = tpu.matmul %41, %43, %cst_31 {dimension_numbers = #tpu.dot_dimension_numbers<[2], [0], [0, 1], [1], [0, 0, 0, 1, 1, 1], [], []>} : vector<8x16x16xbf16>, vector<16x8xbf16>, vector<8x16x8xf32> -> vector<8x16x8xf32>
    %45 = arith.addf %39, %44 : vector<8x16x8xf32>
    %c1_32 = arith.constant 1 : index
    %c0_33 = arith.constant 0 : index
    %c0_34 = arith.constant 0 : index
    %46 = vector.load %arg9[%c1_32, %c0_33, %c0_34] : memref<18x18x16xf32, #tpu.memory_space<vmem>>, vector<8x18x16xf32>
    %47 = vector.extract_strided_slice %46 {offsets = [0, 0, 0], sizes = [8, 16, 16], strides = [1, 1, 1]} : vector<8x18x16xf32> to vector<8x16x16xf32>
    %48 = arith.truncf %47 : vector<8x16x16xf32> to vector<8x16x16xbf16>
    %49 = vector.extract_strided_slice %24 {offsets = [1, 0, 0, 0], sizes = [1, 1, 16, 8], strides = [1, 1, 1, 1]} : vector<3x3x16x8xbf16> to vector<1x1x16x8xbf16>
    %50 = vector.shape_cast %49 : vector<1x1x16x8xbf16> to vector<16x8xbf16>
    %cst_35 = arith.constant dense<0.000000e+00> : vector<8x16x8xf32>
    %51 = tpu.matmul %48, %50, %cst_35 {dimension_numbers = #tpu.dot_dimension_numbers<[2], [0], [0, 1], [1], [0, 0, 0, 1, 1, 1], [], []>} : vector<8x16x16xbf16>, vector<16x8xbf16>, vector<8x16x8xf32> -> vector<8x16x8xf32>
    %52 = arith.addf %45, %51 : vector<8x16x8xf32>
    %53 = vector.extract_strided_slice %46 {offsets = [0, 1, 0], sizes = [8, 16, 16], strides = [1, 1, 1]} : vector<8x18x16xf32> to vector<8x16x16xf32>
    %54 = arith.truncf %53 : vector<8x16x16xf32> to vector<8x16x16xbf16>
    %55 = vector.extract_strided_slice %24 {offsets = [1, 1, 0, 0], sizes = [1, 1, 16, 8], strides = [1, 1, 1, 1]} : vector<3x3x16x8xbf16> to vector<1x1x16x8xbf16>
    %56 = vector.shape_cast %55 : vector<1x1x16x8xbf16> to vector<16x8xbf16>
    %cst_36 = arith.constant dense<0.000000e+00> : vector<8x16x8xf32>
    %57 = tpu.matmul %54, %56, %cst_36 {dimension_numbers = #tpu.dot_dimension_numbers<[2], [0], [0, 1], [1], [0, 0, 0, 1, 1, 1], [], []>} : vector<8x16x16xbf16>, vector<16x8xbf16>, vector<8x16x8xf32> -> vector<8x16x8xf32>
    %58 = arith.addf %52, %57 : vector<8x16x8xf32>
    %59 = vector.extract_strided_slice %46 {offsets = [0, 2, 0], sizes = [8, 16, 16], strides = [1, 1, 1]} : vector<8x18x16xf32> to vector<8x16x16xf32>
    %60 = arith.truncf %59 : vector<8x16x16xf32> to vector<8x16x16xbf16>
    %61 = vector.extract_strided_slice %24 {offsets = [1, 2, 0, 0], sizes = [1, 1, 16, 8], strides = [1, 1, 1, 1]} : vector<3x3x16x8xbf16> to vector<1x1x16x8xbf16>
    %62 = vector.shape_cast %61 : vector<1x1x16x8xbf16> to vector<16x8xbf16>
    %cst_37 = arith.constant dense<0.000000e+00> : vector<8x16x8xf32>
    %63 = tpu.matmul %60, %62, %cst_37 {dimension_numbers = #tpu.dot_dimension_numbers<[2], [0], [0, 1], [1], [0, 0, 0, 1, 1, 1], [], []>} : vector<8x16x16xbf16>, vector<16x8xbf16>, vector<8x16x8xf32> -> vector<8x16x8xf32>
    %64 = arith.addf %58, %63 : vector<8x16x8xf32>
    %c2 = arith.constant 2 : index
    %c0_38 = arith.constant 0 : index
    %c0_39 = arith.constant 0 : index
    %65 = vector.load %arg9[%c2, %c0_38, %c0_39] : memref<18x18x16xf32, #tpu.memory_space<vmem>>, vector<8x18x16xf32>
    %66 = vector.extract_strided_slice %65 {offsets = [0, 0, 0], sizes = [8, 16, 16], strides = [1, 1, 1]} : vector<8x18x16xf32> to vector<8x16x16xf32>
    %67 = arith.truncf %66 : vector<8x16x16xf32> to vector<8x16x16xbf16>
    %68 = vector.extract_strided_slice %24 {offsets = [2, 0, 0, 0], sizes = [1, 1, 16, 8], strides = [1, 1, 1, 1]} : vector<3x3x16x8xbf16> to vector<1x1x16x8xbf16>
    %69 = vector.shape_cast %68 : vector<1x1x16x8xbf16> to vector<16x8xbf16>
    %cst_40 = arith.constant dense<0.000000e+00> : vector<8x16x8xf32>
    %70 = tpu.matmul %67, %69, %cst_40 {dimension_numbers = #tpu.dot_dimension_numbers<[2], [0], [0, 1], [1], [0, 0, 0, 1, 1, 1], [], []>} : vector<8x16x16xbf16>, vector<16x8xbf16>, vector<8x16x8xf32> -> vector<8x16x8xf32>
    %71 = arith.addf %64, %70 : vector<8x16x8xf32>
    %72 = vector.extract_strided_slice %65 {offsets = [0, 1, 0], sizes = [8, 16, 16], strides = [1, 1, 1]} : vector<8x18x16xf32> to vector<8x16x16xf32>
    %73 = arith.truncf %72 : vector<8x16x16xf32> to vector<8x16x16xbf16>
    %74 = vector.extract_strided_slice %24 {offsets = [2, 1, 0, 0], sizes = [1, 1, 16, 8], strides = [1, 1, 1, 1]} : vector<3x3x16x8xbf16> to vector<1x1x16x8xbf16>
    %75 = vector.shape_cast %74 : vector<1x1x16x8xbf16> to vector<16x8xbf16>
    %cst_41 = arith.constant dense<0.000000e+00> : vector<8x16x8xf32>
    %76 = tpu.matmul %73, %75, %cst_41 {dimension_numbers = #tpu.dot_dimension_numbers<[2], [0], [0, 1], [1], [0, 0, 0, 1, 1, 1], [], []>} : vector<8x16x16xbf16>, vector<16x8xbf16>, vector<8x16x8xf32> -> vector<8x16x8xf32>
    %77 = arith.addf %71, %76 : vector<8x16x8xf32>
    %78 = vector.extract_strided_slice %65 {offsets = [0, 2, 0], sizes = [8, 16, 16], strides = [1, 1, 1]} : vector<8x18x16xf32> to vector<8x16x16xf32>
    %79 = arith.truncf %78 : vector<8x16x16xf32> to vector<8x16x16xbf16>
    %80 = vector.extract_strided_slice %24 {offsets = [2, 2, 0, 0], sizes = [1, 1, 16, 8], strides = [1, 1, 1, 1]} : vector<3x3x16x8xbf16> to vector<1x1x16x8xbf16>
    %81 = vector.shape_cast %80 : vector<1x1x16x8xbf16> to vector<16x8xbf16>
    %cst_42 = arith.constant dense<0.000000e+00> : vector<8x16x8xf32>
    %82 = tpu.matmul %79, %81, %cst_42 {dimension_numbers = #tpu.dot_dimension_numbers<[2], [0], [0, 1], [1], [0, 0, 0, 1, 1, 1], [], []>} : vector<8x16x16xbf16>, vector<16x8xbf16>, vector<8x16x8xf32> -> vector<8x16x8xf32>
    %83 = arith.addf %77, %82 : vector<8x16x8xf32>
    %84 = vector.shape_cast %25 : vector<1x8xf32> to vector<1x1x8xf32>
    %85 = vector.broadcast %84 : vector<1x1x8xf32> to vector<8x16x8xf32>
    %86 = arith.addf %83, %85 : vector<8x16x8xf32>
    %c0_43 = arith.constant 0 : index
    %c0_44 = arith.constant 0 : index
    %c0_45 = arith.constant 0 : index
    %c0_46 = arith.constant 0 : index
    %87 = vector.load %arg8[%c0_43, %c0_44, %c0_45, %c0_46] : memref<1x16x16x8xf32, #tpu.memory_space<vmem>>, vector<1x8x16x8xf32>
    %88 = vector.shape_cast %87 : vector<1x8x16x8xf32> to vector<8x16x8xf32>
    %89 = vector.shape_cast %86 : vector<8x16x8xf32> to vector<1x8x16x8xf32>
    tpu.vector_store %arg8[%c0_43, %c0_44, %c0_45, %c0_46], %89 {strides = array<i32>} : memref<1x16x16x8xf32, #tpu.memory_space<vmem>>, vector<1x8x16x8xf32>,
    %cst_47 = arith.constant 0.000000e+00 : f32
    %90 = vector.broadcast %cst_47 : f32 to vector<8x16x8xf32>
    %c8 = arith.constant 8 : index
    %c0_48 = arith.constant 0 : index
    %c0_49 = arith.constant 0 : index
    %91 = vector.load %arg9[%c8, %c0_48, %c0_49] : memref<18x18x16xf32, #tpu.memory_space<vmem>>, vector<8x18x16xf32>
    %92 = vector.extract_strided_slice %91 {offsets = [0, 0, 0], sizes = [8, 16, 16], strides = [1, 1, 1]} : vector<8x18x16xf32> to vector<8x16x16xf32>
    %93 = arith.truncf %92 : vector<8x16x16xf32> to vector<8x16x16xbf16>
    %94 = vector.extract_strided_slice %24 {offsets = [0, 0, 0, 0], sizes = [1, 1, 16, 8], strides = [1, 1, 1, 1]} : vector<3x3x16x8xbf16> to vector<1x1x16x8xbf16>
    %95 = vector.shape_cast %94 : vector<1x1x16x8xbf16> to vector<16x8xbf16>
    %cst_50 = arith.constant dense<0.000000e+00> : vector<8x16x8xf32>
    %96 = tpu.matmul %93, %95, %cst_50 {dimension_numbers = #tpu.dot_dimension_numbers<[2], [0], [0, 1], [1], [0, 0, 0, 1, 1, 1], [], []>} : vector<8x16x16xbf16>, vector<16x8xbf16>, vector<8x16x8xf32> -> vector<8x16x8xf32>
    %97 = arith.addf %90, %96 : vector<8x16x8xf32>
    %98 = vector.extract_strided_slice %91 {offsets = [0, 1, 0], sizes = [8, 16, 16], strides = [1, 1, 1]} : vector<8x18x16xf32> to vector<8x16x16xf32>
    %99 = arith.truncf %98 : vector<8x16x16xf32> to vector<8x16x16xbf16>
    %100 = vector.extract_strided_slice %24 {offsets = [0, 1, 0, 0], sizes = [1, 1, 16, 8], strides = [1, 1, 1, 1]} : vector<3x3x16x8xbf16> to vector<1x1x16x8xbf16>
    %101 = vector.shape_cast %100 : vector<1x1x16x8xbf16> to vector<16x8xbf16>
    %cst_51 = arith.constant dense<0.000000e+00> : vector<8x16x8xf32>
    %102 = tpu.matmul %99, %101, %cst_51 {dimension_numbers = #tpu.dot_dimension_numbers<[2], [0], [0, 1], [1], [0, 0, 0, 1, 1, 1], [], []>} : vector<8x16x16xbf16>, vector<16x8xbf16>, vector<8x16x8xf32> -> vector<8x16x8xf32>
    %103 = arith.addf %97, %102 : vector<8x16x8xf32>
    %104 = vector.extract_strided_slice %91 {offsets = [0, 2, 0], sizes = [8, 16, 16], strides = [1, 1, 1]} : vector<8x18x16xf32> to vector<8x16x16xf32>
    %105 = arith.truncf %104 : vector<8x16x16xf32> to vector<8x16x16xbf16>
    %106 = vector.extract_strided_slice %24 {offsets = [0, 2, 0, 0], sizes = [1, 1, 16, 8], strides = [1, 1, 1, 1]} : vector<3x3x16x8xbf16> to vector<1x1x16x8xbf16>
    %107 = vector.shape_cast %106 : vector<1x1x16x8xbf16> to vector<16x8xbf16>
    %cst_52 = arith.constant dense<0.000000e+00> : vector<8x16x8xf32>
    %108 = tpu.matmul %105, %107, %cst_52 {dimension_numbers = #tpu.dot_dimension_numbers<[2], [0], [0, 1], [1], [0, 0, 0, 1, 1, 1], [], []>} : vector<8x16x16xbf16>, vector<16x8xbf16>, vector<8x16x8xf32> -> vector<8x16x8xf32>
    %109 = arith.addf %103, %108 : vector<8x16x8xf32>
    %c9 = arith.constant 9 : index
    %c0_53 = arith.constant 0 : index
    %c0_54 = arith.constant 0 : index
    %110 = vector.load %arg9[%c9, %c0_53, %c0_54] : memref<18x18x16xf32, #tpu.memory_space<vmem>>, vector<8x18x16xf32>
    %111 = vector.extract_strided_slice %110 {offsets = [0, 0, 0], sizes = [8, 16, 16], strides = [1, 1, 1]} : vector<8x18x16xf32> to vector<8x16x16xf32>
    %112 = arith.truncf %111 : vector<8x16x16xf32> to vector<8x16x16xbf16>
    %113 = vector.extract_strided_slice %24 {offsets = [1, 0, 0, 0], sizes = [1, 1, 16, 8], strides = [1, 1, 1, 1]} : vector<3x3x16x8xbf16> to vector<1x1x16x8xbf16>
    %114 = vector.shape_cast %113 : vector<1x1x16x8xbf16> to vector<16x8xbf16>
    %cst_55 = arith.constant dense<0.000000e+00> : vector<8x16x8xf32>
    %115 = tpu.matmul %112, %114, %cst_55 {dimension_numbers = #tpu.dot_dimension_numbers<[2], [0], [0, 1], [1], [0, 0, 0, 1, 1, 1], [], []>} : vector<8x16x16xbf16>, vector<16x8xbf16>, vector<8x16x8xf32> -> vector<8x16x8xf32>
    %116 = arith.addf %109, %115 : vector<8x16x8xf32>
    %117 = vector.extract_strided_slice %110 {offsets = [0, 1, 0], sizes = [8, 16, 16], strides = [1, 1, 1]} : vector<8x18x16xf32> to vector<8x16x16xf32>
    %118 = arith.truncf %117 : vector<8x16x16xf32> to vector<8x16x16xbf16>
    %119 = vector.extract_strided_slice %24 {offsets = [1, 1, 0, 0], sizes = [1, 1, 16, 8], strides = [1, 1, 1, 1]} : vector<3x3x16x8xbf16> to vector<1x1x16x8xbf16>
    %120 = vector.shape_cast %119 : vector<1x1x16x8xbf16> to vector<16x8xbf16>
    %cst_56 = arith.constant dense<0.000000e+00> : vector<8x16x8xf32>
    %121 = tpu.matmul %118, %120, %cst_56 {dimension_numbers = #tpu.dot_dimension_numbers<[2], [0], [0, 1], [1], [0, 0, 0, 1, 1, 1], [], []>} : vector<8x16x16xbf16>, vector<16x8xbf16>, vector<8x16x8xf32> -> vector<8x16x8xf32>
    %122 = arith.addf %116, %121 : vector<8x16x8xf32>
    %123 = vector.extract_strided_slice %110 {offsets = [0, 2, 0], sizes = [8, 16, 16], strides = [1, 1, 1]} : vector<8x18x16xf32> to vector<8x16x16xf32>
    %124 = arith.truncf %123 : vector<8x16x16xf32> to vector<8x16x16xbf16>
    %125 = vector.extract_strided_slice %24 {offsets = [1, 2, 0, 0], sizes = [1, 1, 16, 8], strides = [1, 1, 1, 1]} : vector<3x3x16x8xbf16> to vector<1x1x16x8xbf16>
    %126 = vector.shape_cast %125 : vector<1x1x16x8xbf16> to vector<16x8xbf16>
    %cst_57 = arith.constant dense<0.000000e+00> : vector<8x16x8xf32>
    %127 = tpu.matmul %124, %126, %cst_57 {dimension_numbers = #tpu.dot_dimension_numbers<[2], [0], [0, 1], [1], [0, 0, 0, 1, 1, 1], [], []>} : vector<8x16x16xbf16>, vector<16x8xbf16>, vector<8x16x8xf32> -> vector<8x16x8xf32>
    %128 = arith.addf %122, %127 : vector<8x16x8xf32>
    %c10 = arith.constant 10 : index
    %c0_58 = arith.constant 0 : index
    %c0_59 = arith.constant 0 : index
    %129 = vector.load %arg9[%c10, %c0_58, %c0_59] : memref<18x18x16xf32, #tpu.memory_space<vmem>>, vector<8x18x16xf32>
    %130 = vector.extract_strided_slice %129 {offsets = [0, 0, 0], sizes = [8, 16, 16], strides = [1, 1, 1]} : vector<8x18x16xf32> to vector<8x16x16xf32>
    %131 = arith.truncf %130 : vector<8x16x16xf32> to vector<8x16x16xbf16>
    %132 = vector.extract_strided_slice %24 {offsets = [2, 0, 0, 0], sizes = [1, 1, 16, 8], strides = [1, 1, 1, 1]} : vector<3x3x16x8xbf16> to vector<1x1x16x8xbf16>
    %133 = vector.shape_cast %132 : vector<1x1x16x8xbf16> to vector<16x8xbf16>
    %cst_60 = arith.constant dense<0.000000e+00> : vector<8x16x8xf32>
    %134 = tpu.matmul %131, %133, %cst_60 {dimension_numbers = #tpu.dot_dimension_numbers<[2], [0], [0, 1], [1], [0, 0, 0, 1, 1, 1], [], []>} : vector<8x16x16xbf16>, vector<16x8xbf16>, vector<8x16x8xf32> -> vector<8x16x8xf32>
    %135 = arith.addf %128, %134 : vector<8x16x8xf32>
    %136 = vector.extract_strided_slice %129 {offsets = [0, 1, 0], sizes = [8, 16, 16], strides = [1, 1, 1]} : vector<8x18x16xf32> to vector<8x16x16xf32>
    %137 = arith.truncf %136 : vector<8x16x16xf32> to vector<8x16x16xbf16>
    %138 = vector.extract_strided_slice %24 {offsets = [2, 1, 0, 0], sizes = [1, 1, 16, 8], strides = [1, 1, 1, 1]} : vector<3x3x16x8xbf16> to vector<1x1x16x8xbf16>
    %139 = vector.shape_cast %138 : vector<1x1x16x8xbf16> to vector<16x8xbf16>
    %cst_61 = arith.constant dense<0.000000e+00> : vector<8x16x8xf32>
    %140 = tpu.matmul %137, %139, %cst_61 {dimension_numbers = #tpu.dot_dimension_numbers<[2], [0], [0, 1], [1], [0, 0, 0, 1, 1, 1], [], []>} : vector<8x16x16xbf16>, vector<16x8xbf16>, vector<8x16x8xf32> -> vector<8x16x8xf32>
    %141 = arith.addf %135, %140 : vector<8x16x8xf32>
    %142 = vector.extract_strided_slice %129 {offsets = [0, 2, 0], sizes = [8, 16, 16], strides = [1, 1, 1]} : vector<8x18x16xf32> to vector<8x16x16xf32>
    %143 = arith.truncf %142 : vector<8x16x16xf32> to vector<8x16x16xbf16>
    %144 = vector.extract_strided_slice %24 {offsets = [2, 2, 0, 0], sizes = [1, 1, 16, 8], strides = [1, 1, 1, 1]} : vector<3x3x16x8xbf16> to vector<1x1x16x8xbf16>
    %145 = vector.shape_cast %144 : vector<1x1x16x8xbf16> to vector<16x8xbf16>
    %cst_62 = arith.constant dense<0.000000e+00> : vector<8x16x8xf32>
    %146 = tpu.matmul %143, %145, %cst_62 {dimension_numbers = #tpu.dot_dimension_numbers<[2], [0], [0, 1], [1], [0, 0, 0, 1, 1, 1], [], []>} : vector<8x16x16xbf16>, vector<16x8xbf16>, vector<8x16x8xf32> -> vector<8x16x8xf32>
    %147 = arith.addf %141, %146 : vector<8x16x8xf32>
    %148 = vector.shape_cast %25 : vector<1x8xf32> to vector<1x1x8xf32>
    %149 = vector.broadcast %148 : vector<1x1x8xf32> to vector<8x16x8xf32>
    %150 = arith.addf %147, %149 : vector<8x16x8xf32>
    %c0_63 = arith.constant 0 : index
    %c8_64 = arith.constant 8 : index
    %c0_65 = arith.constant 0 : index
    %c0_66 = arith.constant 0 : index
    %151 = vector.load %arg8[%c0_63, %c8_64, %c0_65, %c0_66] : memref<1x16x16x8xf32, #tpu.memory_space<vmem>>, vector<1x8x16x8xf32>
    %152 = vector.shape_cast %151 : vector<1x8x16x8xf32> to vector<8x16x8xf32>
    %153 = vector.shape_cast %150 : vector<8x16x8xf32> to vector<1x8x16x8xf32>
    tpu.vector_store %arg8[%c0_63, %c8_64, %c0_65, %c0_66], %153 {strides = array<i32>} : memref<1x16x16x8xf32, #tpu.memory_space<vmem>>, vector<1x8x16x8xf32>,
    return
  }
  func.func @transform_0(%arg0: i32) -> (i32, i32, i32, i32) {
    %c0_i32 = arith.constant 0 : i32
    %c0_i32_0 = arith.constant 0 : i32
    %c0_i32_1 = arith.constant 0 : i32
    %c0_i32_2 = arith.constant 0 : i32
    return %arg0, %c0_i32, %c0_i32_0, %c0_i32_1 : i32, i32, i32, i32
  }
  func.func @transform_1(%arg0: i32) -> (i32, i32) {
    %c0_i32 = arith.constant 0 : i32
    %c0_i32_0 = arith.constant 0 : i32
    %c0_i32_1 = arith.constant 0 : i32
    return %c0_i32, %c0_i32_0 : i32, i32
  }
  func.func @transform_2(%arg0: i32) -> (i32, i32) {
    %c0_i32 = arith.constant 0 : i32
    %c0_i32_0 = arith.constant 0 : i32
    %c0_i32_1 = arith.constant 0 : i32
    return %c0_i32, %c0_i32_0 : i32, i32
  }
  func.func @transform_3(%arg0: i32) -> (i32, i32) {
    %c0_i32 = arith.constant 0 : i32
    %c0_i32_0 = arith.constant 0 : i32
    %c0_i32_1 = arith.constant 0 : i32
    return %c0_i32, %c0_i32_0 : i32, i32
  }
  func.func @transform_4(%arg0: i32) -> (i32, i32) {
    %c0_i32 = arith.constant 0 : i32
    %c0_i32_0 = arith.constant 0 : i32
    %c0_i32_1 = arith.constant 0 : i32
    return %c0_i32, %c0_i32_0 : i32, i32
  }
  func.func @transform_5(%arg0: i32) -> (i32, i32, i32, i32) {
    %c0_i32 = arith.constant 0 : i32
    %c0_i32_0 = arith.constant 0 : i32
    %c0_i32_1 = arith.constant 0 : i32
    %c0_i32_2 = arith.constant 0 : i32
    %c0_i32_3 = arith.constant 0 : i32
    return %c0_i32, %c0_i32_0, %c0_i32_1, %c0_i32_2 : i32, i32, i32, i32
  }
  func.func @transform_6(%arg0: i32) -> (i32, i32) {
    %c0_i32 = arith.constant 0 : i32
    %c0_i32_0 = arith.constant 0 : i32
    %c0_i32_1 = arith.constant 0 : i32
    return %c0_i32, %c0_i32_0 : i32, i32
  }
  func.func @transform_7(%arg0: i32) -> (i32, i32, i32, i32) {
    %c0_i32 = arith.constant 0 : i32
    %c0_i32_0 = arith.constant 0 : i32
    %c0_i32_1 = arith.constant 0 : i32
    %c0_i32_2 = arith.constant 0 : i32
    return %arg0, %c0_i32, %c0_i32_0, %c0_i32_1 : i32, i32, i32, i32
  }
}

</mosaic_0001>

<bundles_post_ra>
// kernel: tpu_custom_call.1
= control target key start
LH: loop header
LB: loop body
LE: loop exit
PB: predicated region body
PF: predicated region fallthrough
CT: control target
= control target key end

     0   :  { %s5463_s24 = smov 0   ;;  %s6661_s0 = inlined_call_operand.vmem [shape: f32[2,16,16,4], index: 0, kind: input, shape index: {}]   ;;  %s6662_s1 = inlined_call_operand.vmem [shape: f32[1,4], index: 1, kind: input, shape index: {}]   ;;  %s6663_s2 = inlined_call_operand.vmem [shape: f32[1,4], index: 2, kind: input, shape index: {}]   ;;  %s6664_s3 = inlined_call_operand.vmem [shape: bf16[4,16], index: 3, kind: input, shape index: {}]   ;;  %s6665_s4 = inlined_call_operand.vmem [shape: f32[1,16], index: 4, kind: input, shape index: {}]   ;;  %s6666_s5 = inlined_call_operand.vmem [shape: bf16[3,3,16,8], index: 5, kind: input, shape index: {}]   ;;  %s6667_s6 = inlined_call_operand.vmem [shape: f32[1,8], index: 6, kind: input, shape index: {}]   ;;  %s6668_s7 = inlined_call_operand.vmem [shape: f32[2,16,16,8], index: 7, kind: output, shape index: {}]  }
   0x1 LB: > { %s4397_s25 = sadd.s32 4294967295, %s5420_s24   ;;  %p4401_p0 = scmp.ge.s32.totalorder %s5420_s24, 1  ;;  %s5420_s24 = sphi %s5463_s24, %s17_s24  }
   0x2   : > { %p237_p1 = scmp.lt.s32.totalorder %s5420_s24, 3 }
   0x4   : > { %p238_p2 = pnand %p4401_p0, %p237_p1 }
   0x5   : > { %v438_v0 = vld [vmem:[%s6664_s3] sm:$0x3] (!%p238_p2)  ;;  %vm495_vm0 = vcmask (!%p238_p2), 1041408   ;;  %p269_p3 = scmp.lt.s32.totalorder (!%p238_p2), %s4397_s25, 1  ;;  %vm446_vm1 = vcmask (!%p238_p2), 31744   ;;  %vm692_vm2 = vcmask (!%p238_p2), 130048  }
   0x6   : > { %241 = sbr.rel (%p238_p2) target bundleno = 784 (0x310), region = 48  ;;  %5394 = vmatprep.subr.msk.bf16.mxu0 (!%p238_p2), %vm495_vm0, %v438_v0  ;;  %v497_v1 = vsel (!%p238_p2), %vm495_vm0, %v438_v0, 0  ;;  %5395 = vmatprep.subr.msk.bf16.mxu1 (!%p238_p2), %vm495_vm0, %v438_v0  ;;  %v5479_v2 = vld [vmem:[%s6662_s1] ss:$0 sm:$0xff] (!%p238_p2)  ;;  %vm695_vm3 = vcmask (!%p238_p2), 123904   ;;  %vm1199_vm5 = vcmask (!%p238_p2), 1046528  }
   0x7   : > { %4779 = vmatpush3.bf16.msra.mxu0 (!%p238_p2), %v497_v1  ;;  %5137 = vmatpush3.bf16.msra.mxu1 (!%p238_p2), %v497_v1  ;;  %v5485_v3 = vld [vmem:[%s6663_s2] ss:$0 sm:$0xff] (!%p238_p2)  ;;  %vm840_vm4 = vsmask.f32 (!%p238_p2), 7424  ;;  %vm2584_vm6 = vcmask (!%p238_p2), 64512  }
   0xd   : > { %s6676_s25 = smov (!%p269_p3, %s4397_s25), 1 }
   0xe   : > { %s4597_s30 = sshll.u32 %s6676_s25, 8 }
   0xf   : > { %s5492_s12 = scalar_lea.vmem %s6661_s0, %s4597_s30  ;;  %s6560_s17 = scalar_lea.vmem %s6668_s7, %s4597_s30 }
  0x10   : > { %v280_v4 = vld [vmem:[%s5492_s12] sm:$0xff]  ;;  %v281_v5 = vld [vmem:[%s5492_s12 + $0x8] sm:$0xff]  ;;  %v282_v6 = vld [vmem:[%s5492_s12 + $0x10] sm:$0xff] }
  0x11   : > { %v319_v7 = vmul.f32 %v5479_v2, %v280_v4  ;;  %v320_v8 = vmul.f32 %v5479_v2, %v281_v5  ;;  %v283_v9 = vld [vmem:[%s5492_s12 + $0x18] sm:$0xff]  ;;  %v321_v10 = vmul.f32 %v5479_v2, %v282_v6  ;;  %v284_v11 = vld [vmem:[%s5492_s12 + $0x20] sm:$0xff]  ;;  %v285_v12 = vld [vmem:[%s5492_s12 + $0x28] sm:$0xff] }
  0x12   : > { %v322_v13 = vmul.f32 %v5479_v2, %v283_v9  ;;  %v323_v14 = vmul.f32 %v5479_v2, %v284_v11  ;;  %v324_v15 = vmul.f32 %v5479_v2, %v285_v12  ;;  %v286_v16 = vld [vmem:[%s5492_s12 + $0x30] sm:$0xff]  ;;  %v287_v17 = vld [vmem:[%s5492_s12 + $0x38] sm:$0xff]  ;;  %v288_v26 = vld [vmem:[%s5492_s12 + $0x40] sm:$0xff] }
  0x13   : > { %v358_v18 = vadd.f32 %v5485_v3, %v319_v7  ;;  %v359_v19 = vadd.f32 %v5485_v3, %v320_v8  ;;  %v360_v20 = vadd.f32 %v5485_v3, %v321_v10  ;;  %v325_v21 = vmul.f32 %v5479_v2, %v286_v16  ;;  %v289_v27 = vld [vmem:[%s5492_s12 + $0x48] sm:$0xff]  ;;  %v290_v32 = vld [vmem:[%s5492_s12 + $0x50] sm:$0xff]  ;;  %v291_v37 = vld [vmem:[%s5492_s12 + $0x58] sm:$0xff] }
  0x14   : > { %v361_v22 = vadd.f32 %v5485_v3, %v322_v13  ;;  %v362_v23 = vadd.f32 %v5485_v3, %v323_v14  ;;  %v363_v24 = vadd.f32 %v5485_v3, %v324_v15  ;;  %v326_v25 = vmul.f32 %v5479_v2, %v287_v17  ;;  %v296_v38 = vld [vmem:[%s5492_s12 + $0x80] sm:$0xff]  ;;  %v297_v43 = vld [vmem:[%s5492_s12 + $0x88] sm:$0xff]  ;;  %v298_v44 = vld [vmem:[%s5492_s12 + $0x90] sm:$0xff] }
  0x15   : > { %v390_v28 = vmax.f32 %v358_v18, 0.0  ;;  %v391_v29 = vmax.f32 %v359_v19, 0.0  ;;  %v392_v30 = vmax.f32 %v360_v20, 0.0  ;;  %v364_v31 = vadd.f32 %v5485_v3, %v325_v21  ;;  %v299_v53 = vld [vmem:[%s5492_s12 + $0x98] sm:$0xff]  ;;  %v292_v54 = vld [vmem:[%s5492_s12 + $0x60] sm:$0xff]  ;;  %v293_v55 = vld [vmem:[%s5492_s12 + $0x68] sm:$0xff] }
  0x16   : > { %v393_v33 = vmax.f32 %v361_v22, 0.0  ;;  %v394_v34 = vmax.f32 %v362_v23, 0.0  ;;  %v395_v35 = vmax.f32 %v363_v24, 0.0  ;;  %v365_v36 = vadd.f32 %v5485_v3, %v326_v25  ;;  %v294_v59 = vld [vmem:[%s5492_s12 + $0x70] sm:$0xff]  ;;  %v295_v60 = vld [vmem:[%s5492_s12 + $0x78] sm:$0xff]  ;;  %v300_v7 = vld [vmem:[%s5492_s12 + $0xa0] sm:$0xff] }
  0x17   : > { %v422_v39 = vpack.c.bf16 %v391_v29, %v390_v28  ;;  %v396_v40 = vmax.f32 %v364_v31, 0.0  ;;  %v327_v41 = vmul.f32 %v5479_v2, %v288_v26  ;;  %v328_v42 = vmul.f32 %v5479_v2, %v289_v27  ;;  %v301_v16 = vld [vmem:[%s5492_s12 + $0xa8] sm:$0xff]  ;;  %v302_v21 = vld [vmem:[%s5492_s12 + $0xb0] sm:$0xff]  ;;  %v303_v26 = vld [vmem:[%s5492_s12 + $0xb8] sm:$0xff] }
  0x18   : > { %v423_v45 = vpack.c.bf16 %v393_v33, %v392_v30  ;;  %v424_v46 = vpack.c.bf16 %v395_v35, %v394_v34  ;;  %v397_v47 = vmax.f32 %v365_v36, 0.0  ;;  %v329_v48 = vmul.f32 %v5479_v2, %v290_v32  ;;  %v304_v29 = vld [vmem:[%s5492_s12 + $0xc0] sm:$0xff]  ;;  %v305_v34 = vld [vmem:[%s5492_s12 + $0xc8] sm:$0xff] }
  0x19   : > { %4780 = vmatprep.mubr.msk.bf16.mxu0 %vm446_vm1, %v422_v39  ;;  %v366_v49 = vadd.f32 %v5485_v3, %v327_v41  ;;  %v367_v50 = vadd.f32 %v5485_v3, %v328_v42  ;;  %v330_v51 = vmul.f32 %v5479_v2, %v291_v37  ;;  %v335_v52 = vmul.f32 %v5479_v2, %v296_v38  ;;  %v306_v39 = vld [vmem:[%s5492_s12 + $0xd0] sm:$0xff] }
  0x1a   : > { %4781 = vmatmul.mubr.msk.bf16.vlgmr.msra.gmra.mrb[0].mxu0 %vm446_vm1, %v423_v45  ;;  %v368_v56 = vadd.f32 %v5485_v3, %v329_v48  ;;  %v336_v57 = vmul.f32 %v5479_v2, %v297_v43  ;;  %v337_v58 = vmul.f32 %v5479_v2, %v298_v44  ;;  %v425_v1 = vpack.c.bf16 %v397_v47, %v396_v40  ;;  %v307_v40 = vld [vmem:[%s5492_s12 + $0xd8] sm:$0xff]  ;;  %v308_v45 = vld [vmem:[%s5492_s12 + $0xe0] sm:$0xff] }
  0x1b   : > { %4784 = vmatprep.mubr.msk.bf16.mxu0 %vm446_vm1, %v424_v46  ;;  %v398_v61 = vmax.f32 %v366_v49, 0.0  ;;  %v399_v62 = vmax.f32 %v367_v50, 0.0  ;;  %v369_v63 = vadd.f32 %v5485_v3, %v330_v51  ;;  %v374_v0 = vadd.f32 %v5485_v3, %v335_v52  ;;  %v309_v50 = vld [vmem:[%s5492_s12 + $0xe8] sm:$0xff] }
  0x1c   : > { %v375_v4 = vadd.f32 %v5485_v3, %v336_v57  ;;  %v338_v5 = vmul.f32 %v5479_v2, %v299_v53  ;;  %v376_v6 = vadd.f32 %v5485_v3, %v337_v58  ;;  %v400_v9 = vmax.f32 %v368_v56, 0.0 }
  0x1d   : > { %v426_v8 = vpack.c.bf16 %v399_v62, %v398_v61  ;;  %v406_v10 = vmax.f32 %v374_v0, 0.0  ;;  %v331_v11 = vmul.f32 %v5479_v2, %v292_v54  ;;  %v332_v15 = vmul.f32 %v5479_v2, %v293_v55 }
  0x1e   : > { %v407_v12 = vmax.f32 %v375_v4, 0.0  ;;  %v377_v13 = vadd.f32 %v5485_v3, %v338_v5  ;;  %v408_v14 = vmax.f32 %v376_v6, 0.0  ;;  %v401_v17 = vmax.f32 %v369_v63, 0.0  ;;  %v310_v4 = vld [vmem:[%s5492_s12 + $0xf0] sm:$0xff]  ;;  %v311_v5 = vld [vmem:[%s5492_s12 + $0xf8] sm:$0xff] }
  0x1f   : > { %v370_v18 = vadd.f32 %v5485_v3, %v331_v11  ;;  %v333_v19 = vmul.f32 %v5479_v2, %v294_v59  ;;  %v334_v20 = vmul.f32 %v5479_v2, %v295_v60  ;;  %v371_v24 = vadd.f32 %v5485_v3, %v332_v15 }
  0x20   : > { %v430_v22 = vpack.c.bf16 %v407_v12, %v406_v10  ;;  %v409_v23 = vmax.f32 %v377_v13, 0.0  ;;  %v339_v25 = vmul.f32 %v5479_v2, %v300_v7  ;;  %v340_v28 = vmul.f32 %v5479_v2, %v301_v16 }
  0x21   : > { %v402_v27 = vmax.f32 %v370_v18, 0.0  ;;  %v403_v31 = vmax.f32 %v371_v24, 0.0  ;;  %v341_v33 = vmul.f32 %v5479_v2, %v302_v21  ;;  %v427_v35 = vpack.c.bf16 %v401_v17, %v400_v9 }
  0x22   : > { %4785 = vmatmul.mubr.msk.bf16.gmra.mrb[4].mxu0 %vm446_vm1, %v425_v1  ;;  %4796 = vmatprep.mubr.msk.bf16.mxu1 %vm446_vm1, %v430_v22  ;;  %v431_v30 = vpack.c.bf16 %v409_v23, %v408_v14  ;;  %v378_v32 = vadd.f32 %v5485_v3, %v339_v25  ;;  %v372_v36 = vadd.f32 %v5485_v3, %v333_v19  ;;  %v5422_v23 = vmov 0.0  }
  0x23   : > { %4788 = vmatprep.mubr.msk.bf16.mxu0 %vm446_vm1, %v426_v8  ;;  %v379_v37 = vadd.f32 %v5485_v3, %v340_v28  ;;  %v342_v38 = vmul.f32 %v5479_v2, %v303_v26  ;;  %v373_v41 = vadd.f32 %v5485_v3, %v334_v20  ;;  %v380_v43 = vadd.f32 %v5485_v3, %v341_v33 }
  0x24   : > { %4797 = vmatmul.mubr.msk.bf16.vlgmr.msra.gmra.mrb[0].mxu1 %vm446_vm1, %v431_v30  ;;  %v410_v42 = vmax.f32 %v378_v32, 0.0  ;;  %v343_v44 = vmul.f32 %v5479_v2, %v304_v29  ;;  %v428_v46 = vpack.c.bf16 %v403_v31, %v402_v27  ;;  %v344_v49 = vmul.f32 %v5479_v2, %v305_v34  ;;  %700 = vst.msk [vmem:[#allocation2 + $0x30] sm:$0xff] %vm692_vm2, %v5422_v23  ;;  %v5405_v29 = vld [vmem:[%s6666_s5 + $0x8] sm:$0xff]  }
  0x25   : > { %v411_v47 = vmax.f32 %v379_v37, 0.0  ;;  %v381_v48 = vadd.f32 %v5485_v3, %v342_v38  ;;  %v412_v51 = vmax.f32 %v380_v43, 0.0  ;;  %v345_v53 = vmul.f32 %v5479_v2, %v306_v39  ;;  %701 = vst.msk [vmem:[#allocation2 + $0x38] sm:$0xff] %vm692_vm2, %v5422_v23  ;;  %693 = vst.msk [vmem:[#allocation2] sm:$0xff] %vm692_vm2, %v5422_v23  ;;  %4812 = vmatprep.subr.bf16.mxu1 %v5405_v29  ;;  %v5682_v37 = vld [vmem:[%s6665_s4] ss:$0 sm:$0xff] }
  0x26   : > { %v382_v52 = vadd.f32 %v5485_v3, %v343_v44  ;;  %v346_v54 = vmul.f32 %v5479_v2, %v307_v40  ;;  %v383_v57 = vadd.f32 %v5485_v3, %v344_v49  ;;  %v347_v58 = vmul.f32 %v5479_v2, %v308_v45  ;;  %694 = vst.msk [vmem:[#allocation2 + $0x8] sm:$0xff] %vm692_vm2, %v5422_v23 }
  0x27   : > { %v432_v55 = vpack.c.bf16 %v411_v47, %v410_v42  ;;  %v413_v56 = vmax.f32 %v381_v48, 0.0  ;;  %v384_v60 = vadd.f32 %v5485_v3, %v345_v53  ;;  %v348_v62 = vmul.f32 %v5479_v2, %v309_v50  ;;  %697 = vst.msk [vmem:[#allocation2 + $0x18] sm:$0xff] %vm692_vm2, %v5422_v23  ;;  %698 = vst.msk [vmem:[#allocation2 + $0x20] sm:$0xff] %vm692_vm2, %v5422_v23 }
  0x28   : > { %v414_v59 = vmax.f32 %v382_v52, 0.0  ;;  %v385_v61 = vadd.f32 %v5485_v3, %v346_v54  ;;  %v415_v0 = vmax.f32 %v383_v57, 0.0  ;;  %v386_v1 = vadd.f32 %v5485_v3, %v347_v58  ;;  %703 = vst.msk [vmem:[#allocation2 + $0x48] sm:$0xff] %vm692_vm2, %v5422_v23  ;;  %704 = vst.msk [vmem:[#allocation2 + $0x50] sm:$0xff] %vm692_vm2, %v5422_v23  ;;  %4974 = vmatprep.subr.bf16.mxu0 %v5405_v29 }
  0x29   : > { %4800 = vmatprep.mubr.msk.bf16.mxu1 %vm446_vm1, %v432_v55  ;;  %v433_v63 = vpack.c.bf16 %v413_v56, %v412_v51  ;;  %v404_v6 = vmax.f32 %v372_v36, 0.0  ;;  %v405_v7 = vmax.f32 %v373_v41, 0.0  ;;  %v387_v8 = vadd.f32 %v5485_v3, %v348_v62  ;;  %706 = vst.msk [vmem:[#allocation2 + $0x60] sm:$0xff] %vm692_vm2, %v5422_v23  ;;  %707 = vst.msk [vmem:[#allocation2 + $0x68] sm:$0xff] %vm692_vm2, %v5422_v23  ;;  %v5675_v36 = vld [vmem:[%s6666_s5] sm:$0xff]  }
  0x2a   : > { %4789 = vmatmul.mubr.msk.bf16.gmra.mrb[8].mxu0 %vm446_vm1, %v427_v35  ;;  %v434_v9 = vpack.c.bf16 %v415_v0, %v414_v59  ;;  %v416_v10 = vmax.f32 %v384_v60, 0.0  ;;  %v417_v11 = vmax.f32 %v385_v61, 0.0  ;;  %v349_v12 = vmul.f32 %v5479_v2, %v310_v4  ;;  %709 = vst.msk [vmem:[#allocation2 + $0x78] sm:$0xff] %vm692_vm2, %v5422_v23  ;;  %710 = vst.msk [vmem:[#allocation2 + $0x80] sm:$0xff] %vm692_vm2, %v5422_v23 }
  0x2b   : > { %4792 = vmatprep.mubr.msk.bf16.mxu0 %vm446_vm1, %v428_v46  ;;  %v350_v13 = vmul.f32 %v5479_v2, %v311_v5  ;;  %v418_v14 = vmax.f32 %v386_v1, 0.0  ;;  %v419_v15 = vmax.f32 %v387_v8, 0.0  ;;  %v429_v16 = vpack.c.bf16 %v405_v7, %v404_v6  ;;  %712 = vst.msk [vmem:[#allocation2 + $0x90] sm:$0xff] %vm692_vm2, %v5422_v23  ;;  %713 = vst.msk [vmem:[#allocation2 + $0x98] sm:$0xff] %vm692_vm2, %v5422_v23 }
  0x2c   : > { %4801 = vmatmul.mubr.msk.bf16.gmra.mrb[4].mxu1 %vm446_vm1, %v433_v63  ;;  %v435_v17 = vpack.c.bf16 %v417_v11, %v416_v10  ;;  %v388_v18 = vadd.f32 %v5485_v3, %v349_v12  ;;  %715 = vst.msk [vmem:[#allocation2 + $0xa8] sm:$0xff] %vm692_vm2, %v5422_v23  ;;  %716 = vst.msk [vmem:[#allocation2 + $0xb0] sm:$0xff] %vm692_vm2, %v5422_v23  ;;  %4975 = vmatpush3.bf16.msra.mxu0 %v5405_v29 }
  0x2d   : > { %4804 = vmatprep.mubr.msk.bf16.mxu1 %vm446_vm1, %v434_v9  ;;  %v389_v19 = vadd.f32 %v5485_v3, %v350_v13  ;;  %v436_v20 = vpack.c.bf16 %v419_v15, %v418_v14  ;;  %718 = vst.msk [vmem:[#allocation2 + $0xc0] sm:$0xff] %vm692_vm2, %v5422_v23  ;;  %719 = vst.msk [vmem:[#allocation2 + $0xc8] sm:$0xff] %vm692_vm2, %v5422_v23  ;;  %v800_v3 = vld [vmem:[#allocation2] sm:$0xff]  ;;  %v801_v24 = vld [vmem:[#allocation2 + $0x8] sm:$0xff]  ;;  %4813 = vmatpush3.bf16.msra.mxu1 %v5405_v29 }
  0x2e   : > { %v420_v21 = vmax.f32 %v388_v18, 0.0  ;;  %721 = vst.msk [vmem:[#allocation2 + $0xd8] sm:$0xff] %vm692_vm2, %v5422_v23  ;;  %722 = vst.msk [vmem:[#allocation2 + $0xe0] sm:$0xff] %vm692_vm2, %v5422_v23  ;;  %v5660_v25 = vpack.c.bf16 %v801_v24, %v800_v3  ;;  %4830 = vmatprep.subr.bf16.mxu1 %v5675_v36  ;;  %4992 = vmatprep.subr.bf16.mxu0 %v5675_v36 }
  0x2f   : > { %v421_v22 = vmax.f32 %v389_v19, 0.0  ;;  %724 = vst.msk [vmem:[#allocation2 + $0xf0] sm:$0xff] %vm692_vm2, %v5422_v23  ;;  %725 = vst.msk [vmem:[#allocation2 + $0xf8] sm:$0xff] %vm692_vm2, %v5422_v23 }
  0x30   : > { %727 = vst.msk [vmem:[#allocation2 + $0x108] sm:$0xff] %vm692_vm2, %v5422_v23  ;;  %728 = vst.msk [vmem:[#allocation2 + $0x110] sm:$0xff] %vm692_vm2, %v5422_v23  ;;  %v844_v28 = vshll.u32 %v5660_v25, 16  ;;  %v842_v30 = vshrl.u32 %v5660_v25, 16 }
  0x31   : > { %v437_v2 = vpack.c.bf16 %v421_v22, %v420_v21  ;;  %730 = vst.msk [vmem:[#allocation2 + $0x120] sm:$0xff] %vm692_vm2, %v5422_v23  ;;  %731 = vst.msk [vmem:[#allocation2 + $0x128] sm:$0xff] %vm692_vm2, %v5422_v23 }
  0x32   : > { %4793 = vmatmul.mubr.msk.bf16.gmra.mrb[12].mxu0 %vm446_vm1, %v429_v16  ;;  %733 = vst.msk [vmem:[#allocation2 + $0x138] sm:$0xff] %vm692_vm2, %v5422_v23  ;;  %734 = vst.msk [vmem:[#allocation2 + $0x140] sm:$0xff] %vm692_vm2, %v5422_v23  ;;  %v846_v31 = vrot.slane %v844_v28, 1 }
  0x33   : > { %736 = vst.msk [vmem:[#allocation2 + $0x150] sm:$0xff] %vm692_vm2, %v5422_v23  ;;  %737 = vst.msk [vmem:[#allocation2 + $0x158] sm:$0xff] %vm692_vm2, %v5422_v23 }
  0x34   : > { %4805 = vmatmul.mubr.msk.bf16.gmra.mrb[8].mxu1 %vm446_vm1, %v435_v17  ;;  %739 = vst.msk [vmem:[#allocation2 + $0x168] sm:$0xff] %vm692_vm2, %v5422_v23  ;;  %740 = vst.msk [vmem:[#allocation2 + $0x170] sm:$0xff] %vm692_vm2, %v5422_v23  ;;  %v847_v33 = vor.u32 %v846_v31, %v842_v30 }
  0x35   : > { %4808 = vmatprep.mubr.msk.bf16.mxu1 %vm446_vm1, %v436_v20  ;;  %742 = vst.msk [vmem:[#allocation2 + $0x180] sm:$0xff] %vm692_vm2, %v5422_v23  ;;  %743 = vst.msk [vmem:[#allocation2 + $0x188] sm:$0xff] %vm692_vm2, %v5422_v23 }
  0x36   : > { %745 = vst.msk [vmem:[#allocation2 + $0x198] sm:$0xff] %vm692_vm2, %v5422_v23  ;;  %746 = vst.msk [vmem:[#allocation2 + $0x1a0] sm:$0xff] %vm692_vm2, %v5422_v23 }
  0x37   : > { %702 = vst.msk [vmem:[#allocation2 + $0x40] sm:$0x3] %vm695_vm3, %v5422_v23  ;;  %696 = vst.msk [vmem:[#allocation2 + $0x10] sm:$0x3] %vm695_vm3, %v5422_v23 }
  0x38   : > { %699 = vst.msk [vmem:[#allocation2 + $0x28] sm:$0x3] %vm695_vm3, %v5422_v23  ;;  %705 = vst.msk [vmem:[#allocation2 + $0x58] sm:$0x3] %vm695_vm3, %v5422_v23 }
  0x39   : > { %708 = vst.msk [vmem:[#allocation2 + $0x70] sm:$0x3] %vm695_vm3, %v5422_v23  ;;  %711 = vst.msk [vmem:[#allocation2 + $0x88] sm:$0x3] %vm695_vm3, %v5422_v23 }
  0x3a   : > { %714 = vst.msk [vmem:[#allocation2 + $0xa0] sm:$0x3] %vm695_vm3, %v5422_v23  ;;  %717 = vst.msk [vmem:[#allocation2 + $0xb8] sm:$0x3] %vm695_vm3, %v5422_v23 }
  0x3b   : > { %720 = vst.msk [vmem:[#allocation2 + $0xd0] sm:$0x3] %vm695_vm3, %v5422_v23  ;;  %723 = vst.msk [vmem:[#allocation2 + $0xe8] sm:$0x3] %vm695_vm3, %v5422_v23 }
  0x3c   : > { %4809 = vmatmul.mubr.msk.bf16.gmra.mrb[12].mxu1 %vm446_vm1, %v437_v2  ;;  %726 = vst.msk [vmem:[#allocation2 + $0x100] sm:$0x3] %vm695_vm3, %v5422_v23  ;;  %729 = vst.msk [vmem:[#allocation2 + $0x118] sm:$0x3] %vm695_vm3, %v5422_v23 }
  0x3d   : > { %732 = vst.msk [vmem:[#allocation2 + $0x130] sm:$0x3] %vm695_vm3, %v5422_v23  ;;  %735 = vst.msk [vmem:[#allocation2 + $0x148] sm:$0x3] %vm695_vm3, %v5422_v23 }
  0x3e   : > { %738 = vst.msk [vmem:[#allocation2 + $0x160] sm:$0x3] %vm695_vm3, %v5422_v23  ;;  %741 = vst.msk [vmem:[#allocation2 + $0x178] sm:$0x3] %vm695_vm3, %v5422_v23  ;;  %v802_v26 = vld [vmem:[#allocation2 + $0x10] sm:$0x3] }
  0x3f   : > { %744 = vst.msk [vmem:[#allocation2 + $0x190] sm:$0x3] %vm695_vm3, %v5422_v23  ;;  %747 = vst.msk [vmem:[#allocation2 + $0x1a8] sm:$0x3] %vm695_vm3, %v5422_v23  ;;  %v5662_v27 = vpack.c.bf16 %v802_v26, %v802_v26 }
  0x41   : > { %v849_v32 = vshll.u32 %v5662_v27, 16 }
  0x43   : > { %v851_v34 = vrot.slane %v849_v32, 1 }
  0x45   : > { %v852_v35 = vsel %vm840_vm4, %v847_v33, %v851_v34 }
  0x46   : > { %4814 = vmatprep.mubr.msk.bf16.mxu1 %vm692_vm2, %v852_v35 }
  0xed   : > { %v4782_v38 = vpop.f32.mrb[0].mxu0 }
  0xee   : > { %v542_v39 = vadd.f32 %v4782_v38, %v5682_v37  ;;  %v533_v40 = vpop.f32.mrb[1].mxu0 }
  0xef   : > { %v534_v41 = vadd.f32 %v5682_v37, %v533_v40  ;;  %v4783_v42 = vpop.f32.mrb[2].mxu0 }
  0xf0   : > { %v662_v43 = vmax.f32 %v542_v39, 0.0  ;;  %v545_v44 = vadd.f32 %v4783_v42, %v5682_v37  ;;  %v536_v45 = vpop.f32.mrb[3].mxu0 }
  0xf1   : > { %v660_v46 = vmax.f32 %v534_v41, 0.0  ;;  %v537_v47 = vadd.f32 %v5682_v37, %v536_v45 }
  0xf2   : > { %751 = vst.msk [vmem:[#allocation2 + $0x31] sm:$0xff] %vm692_vm2, %v662_v43  ;;  %v663_v48 = vmax.f32 %v545_v44, 0.0 }
  0xf3   : > { %749 = vst.msk [vmem:[#allocation2 + $0x19] sm:$0xff] %vm692_vm2, %v660_v46  ;;  %v661_v49 = vmax.f32 %v537_v47, 0.0 }
  0xf4   : > { %752 = vst.msk [vmem:[#allocation2 + $0x39] sm:$0xff] %vm692_vm2, %v663_v48 }
  0xf5   : > { %750 = vst.msk [vmem:[#allocation2 + $0x21] sm:$0xff] %vm692_vm2, %v661_v49  ;;  %v4786_v50 = vpop.f32.mrb[4].mxu0 }
  0xf6   : > { %v558_v51 = vadd.f32 %v4786_v50, %v5682_v37  ;;  %v549_v52 = vpop.f32.mrb[5].mxu0 }
  0xf7   : > { %v550_v53 = vadd.f32 %v5682_v37, %v549_v52  ;;  %v4787_v54 = vpop.f32.mrb[6].mxu0  ;;  %v4798_v55 = vpop.f32.mrb[0].mxu1  ;;  %v5734_v52 = vld [vmem:[%s6666_s5 + $0x10] sm:$0xff]  }
  0xf8   : > { %v666_v56 = vmax.f32 %v558_v51, 0.0  ;;  %v561_v57 = vadd.f32 %v4787_v54, %v5682_v37  ;;  %v552_v58 = vpop.f32.mrb[7].mxu0  ;;  %v606_v59 = vadd.f32 %v4798_v55, %v5682_v37  ;;  %v597_v60 = vpop.f32.mrb[1].mxu1 }
  0xf9   : > { %v664_v61 = vmax.f32 %v550_v53, 0.0  ;;  %v553_v62 = vadd.f32 %v5682_v37, %v552_v58  ;;  %v598_v63 = vadd.f32 %v5682_v37, %v597_v60  ;;  %v4799_v0 = vpop.f32.mrb[2].mxu1  ;;  %v806_v10 = vld [vmem:[#allocation2 + $0x30] sm:$0xff] }
  0xfa   : > { %755 = vst.msk [vmem:[#allocation2 + $0x61] sm:$0xff] %vm692_vm2, %v666_v56  ;;  %v667_v1 = vmax.f32 %v561_v57, 0.0  ;;  %v678_v4 = vmax.f32 %v606_v59, 0.0  ;;  %v609_v5 = vadd.f32 %v4799_v0, %v5682_v37  ;;  %v600_v6 = vpop.f32.mrb[3].mxu1  ;;  %v803_v14 = vld [vmem:[#allocation2 + $0x18] sm:$0xff] }
  0xfb   : > { %753 = vst.msk [vmem:[#allocation2 + $0x49] sm:$0xff] %vm692_vm2, %v664_v61  ;;  %v665_v7 = vmax.f32 %v553_v62, 0.0  ;;  %v676_v8 = vmax.f32 %v598_v63, 0.0  ;;  %v601_v9 = vadd.f32 %v5682_v37, %v600_v6  ;;  %v807_v11 = vld [vmem:[#allocation2 + $0x38] sm:$0xff]  ;;  %v808_v12 = vld [vmem:[#allocation2 + $0x40] sm:$0x3] }
  0xfc   : > { %756 = vst.msk [vmem:[#allocation2 + $0x69] sm:$0xff] %vm692_vm2, %v667_v1  ;;  %767 = vst.msk [vmem:[#allocation2 + $0xf1] sm:$0xff] %vm692_vm2, %v678_v4  ;;  %v679_v13 = vmax.f32 %v609_v5, 0.0  ;;  %v804_v15 = vld [vmem:[#allocation2 + $0x20] sm:$0xff]  ;;  %v805_v16 = vld [vmem:[#allocation2 + $0x28] sm:$0x3]  ;;  %v5704_v17 = vpack.c.bf16 %v807_v11, %v806_v10  ;;  %v5706_v18 = vpack.c.bf16 %v808_v12, %v808_v12 }
  0xfd   : > { %754 = vst.msk [vmem:[#allocation2 + $0x51] sm:$0xff] %vm692_vm2, %v665_v7  ;;  %v4790_v19 = vpop.f32.mrb[8].mxu0  ;;  %765 = vst.msk [vmem:[#allocation2 + $0xd9] sm:$0xff] %vm692_vm2, %v676_v8  ;;  %v677_v20 = vmax.f32 %v601_v9, 0.0  ;;  %v5710_v21 = vpack.c.bf16 %v804_v15, %v803_v14  ;;  %v5712_v22 = vpack.c.bf16 %v805_v16, %v805_v16 }
  0xfe   : > { %v574_v2 = vadd.f32 %v4790_v19, %v5682_v37  ;;  %v565_v23 = vpop.f32.mrb[9].mxu0  ;;  %768 = vst.msk [vmem:[#allocation2 + $0xf9] sm:$0xff] %vm692_vm2, %v679_v13  ;;  %v866_v3 = vshrl.u32 %v5704_v17, 16  ;;  %v868_v24 = vshll.u32 %v5704_v17, 16  ;;  %v873_v26 = vshll.u32 %v5706_v18, 16 }
  0xff   : > { %v566_v28 = vadd.f32 %v5682_v37, %v565_v23  ;;  %v4791_v29 = vpop.f32.mrb[10].mxu0  ;;  %766 = vst.msk [vmem:[#allocation2 + $0xe1] sm:$0xff] %vm692_vm2, %v677_v20  ;;  %v854_v30 = vshrl.u32 %v5710_v21, 16  ;;  %v856_v31 = vshll.u32 %v5710_v21, 16  ;;  %v861_v32 = vshll.u32 %v5712_v22, 16  ;;  %v4802_v33 = vpop.f32.mrb[4].mxu1 }
 0x100   : > { %v670_v34 = vmax.f32 %v574_v2, 0.0  ;;  %v577_v35 = vadd.f32 %v4791_v29, %v5682_v37  ;;  %v568_v38 = vpop.f32.mrb[11].mxu0  ;;  %v870_v39 = vrot.slane %v868_v24, 1  ;;  %v875_v40 = vrot.slane %v873_v26, 1  ;;  %v613_v41 = vpop.f32.mrb[5].mxu1 }
 0x101   : > { %v668_v42 = vmax.f32 %v566_v28, 0.0  ;;  %v569_v43 = vadd.f32 %v5682_v37, %v568_v38  ;;  %v858_v44 = vrot.slane %v856_v31, 1  ;;  %v863_v45 = vrot.slane %v861_v32, 1  ;;  %v4803_v46 = vpop.f32.mrb[6].mxu1  ;;  %v812_v57 = vld [vmem:[#allocation2 + $0x60] sm:$0xff] }
 0x102   : > { %759 = vst.msk [vmem:[#allocation2 + $0x91] sm:$0xff] %vm692_vm2, %v670_v34  ;;  %v671_v47 = vmax.f32 %v577_v35, 0.0  ;;  %v5727_v48 = vor.u32 %v870_v39, %v866_v3  ;;  %v622_v49 = vadd.f32 %v4802_v33, %v5682_v37  ;;  %v614_v50 = vadd.f32 %v5682_v37, %v613_v41  ;;  %v616_v51 = vpop.f32.mrb[7].mxu1  ;;  %v809_v63 = vld [vmem:[#allocation2 + $0x48] sm:$0xff] }
 0x103   : > { %757 = vst.msk [vmem:[#allocation2 + $0x79] sm:$0xff] %vm692_vm2, %v668_v42  ;;  %v669_v53 = vmax.f32 %v569_v43, 0.0  ;;  %v5737_v54 = vor.u32 %v858_v44, %v854_v30  ;;  %v625_v55 = vadd.f32 %v4803_v46, %v5682_v37  ;;  %v617_v56 = vadd.f32 %v5682_v37, %v616_v51  ;;  %v813_v58 = vld [vmem:[#allocation2 + $0x68] sm:$0xff]  ;;  %v814_v59 = vld [vmem:[#allocation2 + $0x70] sm:$0x3] }
 0x104   : > { %760 = vst.msk [vmem:[#allocation2 + $0x99] sm:$0xff] %vm692_vm2, %v671_v47  ;;  %v876_v60 = vsel %vm840_vm4, %v5727_v48, %v875_v40  ;;  %v682_v61 = vmax.f32 %v622_v49, 0.0  ;;  %v680_v62 = vmax.f32 %v614_v50, 0.0  ;;  %v810_v0 = vld [vmem:[#allocation2 + $0x50] sm:$0xff]  ;;  %v811_v1 = vld [vmem:[#allocation2 + $0x58] sm:$0x3]  ;;  %v5744_v4 = vpack.c.bf16 %v813_v58, %v812_v57 }
 0x105   : > { %758 = vst.msk [vmem:[#allocation2 + $0x81] sm:$0xff] %vm692_vm2, %v669_v53  ;;  %v4794_v5 = vpop.f32.mrb[12].mxu0  ;;  %v864_v6 = vsel %vm840_vm4, %v5737_v54, %v863_v45  ;;  %v683_v7 = vmax.f32 %v625_v55, 0.0  ;;  %v681_v8 = vmax.f32 %v617_v56, 0.0  ;;  %v5749_v9 = vpack.c.bf16 %v810_v0, %v809_v63  ;;  %v2605_v0 = vld [vmem:[#allocation2 + $0xd8] sm:$0xff] }
 0x106   : > { %v590_v10 = vadd.f32 %v4794_v5, %v5682_v37  ;;  %v581_v11 = vpop.f32.mrb[13].mxu0  ;;  %4815 = vmatmul.mubr.msk.bf16.vlgmr.msra.gmra.mrb[16].mxu1 %vm692_vm2, %v864_v6  ;;  %771 = vst.msk [vmem:[#allocation2 + $0x121] sm:$0xff] %vm692_vm2, %v682_v61  ;;  %769 = vst.msk [vmem:[#allocation2 + $0x109] sm:$0xff] %vm692_vm2, %v680_v62  ;;  %v5755_v12 = vpack.c.bf16 %v811_v1, %v811_v1  ;;  %v5757_v13 = vpack.c.bf16 %v814_v59, %v814_v59  ;;  %v2606_v1 = vld [vmem:[#allocation2 + $0xe0] sm:$0xff] }
 0x107   : > { %v890_v14 = vshrl.u32 %v5744_v4, 16  ;;  %v582_v15 = vadd.f32 %v5682_v37, %v581_v11  ;;  %v4795_v16 = vpop.f32.mrb[14].mxu0  ;;  %4818 = vmatprep.mubr.msk.bf16.mxu1 %vm692_vm2, %v876_v60  ;;  %772 = vst.msk [vmem:[#allocation2 + $0x129] sm:$0xff] %vm692_vm2, %v683_v7  ;;  %770 = vst.msk [vmem:[#allocation2 + $0x111] sm:$0xff] %vm692_vm2, %v681_v8  ;;  %v878_v19 = vshrl.u32 %v5749_v9, 16  ;;  %v880_v20 = vshll.u32 %v5749_v9, 16  ;;  %4831 = vmatpush3.bf16.msra.mxu1 %v5675_v36 }
 0x108   : > { %v892_v2 = vshll.u32 %v5744_v4, 16  ;;  %v4806_v23 = vpop.f32.mrb[8].mxu1  ;;  %v674_v3 = vmax.f32 %v590_v10, 0.0  ;;  %v593_v24 = vadd.f32 %v4795_v16, %v5682_v37  ;;  %v584_v26 = vpop.f32.mrb[15].mxu0  ;;  %v885_v28 = vshll.u32 %v5755_v12, 16  ;;  %4848 = vmatprep.subr.bf16.mxu1 %v5734_v52 }
 0x109   : > { %v897_v29 = vshll.u32 %v5757_v13, 16  ;;  %v629_v30 = vpop.f32.mrb[9].mxu1  ;;  %v672_v31 = vmax.f32 %v582_v15, 0.0  ;;  %v585_v32 = vadd.f32 %v5682_v37, %v584_v26  ;;  %v882_v33 = vrot.slane %v880_v20, 1  ;;  %v818_v47 = vld [vmem:[#allocation2 + $0x90] sm:$0xff] }
 0x10a   : > { %v894_v34 = vrot.slane %v892_v2, 1  ;;  %v4807_v35 = vpop.f32.mrb[10].mxu1  ;;  %763 = vst.msk [vmem:[#allocation2 + $0xc1] sm:$0xff] %vm692_vm2, %v674_v3  ;;  %v675_v38 = vmax.f32 %v593_v24, 0.0  ;;  %v887_v39 = vrot.slane %v885_v28, 1  ;;  %v638_v41 = vadd.f32 %v4806_v23, %v5682_v37  ;;  %v815_v56 = vld [vmem:[#allocation2 + $0x78] sm:$0xff] }
 0x10b   : > { %v899_v40 = vrot.slane %v897_v29, 1  ;;  %v632_v42 = vpop.f32.mrb[11].mxu1  ;;  %761 = vst.msk [vmem:[#allocation2 + $0xa9] sm:$0xff] %vm692_vm2, %v672_v31  ;;  %v673_v43 = vmax.f32 %v585_v32, 0.0  ;;  %v5776_v44 = vor.u32 %v882_v33, %v878_v19  ;;  %v630_v46 = vadd.f32 %v5682_v37, %v629_v30  ;;  %v819_v49 = vld [vmem:[#allocation2 + $0x98] sm:$0xff] }
 0x10c   : > { %v5778_v45 = vor.u32 %v894_v34, %v890_v14  ;;  %v820_v50 = vld [vmem:[#allocation2 + $0xa0] sm:$0x3]  ;;  %764 = vst.msk [vmem:[#allocation2 + $0xc9] sm:$0xff] %vm692_vm2, %v675_v38  ;;  %v686_v51 = vmax.f32 %v638_v41, 0.0  ;;  %v641_v53 = vadd.f32 %v4807_v35, %v5682_v37  ;;  %v633_v55 = vadd.f32 %v5682_v37, %v632_v42  ;;  %v817_v58 = vld [vmem:[#allocation2 + $0x88] sm:$0x3] }
 0x10d   : > { %v816_v57 = vld [vmem:[#allocation2 + $0x80] sm:$0xff]  ;;  %v5784_v59 = vpack.c.bf16 %v819_v49, %v818_v47  ;;  %762 = vst.msk [vmem:[#allocation2 + $0xb1] sm:$0xff] %vm692_vm2, %v673_v43  ;;  %v888_v60 = vsel %vm840_vm4, %v5776_v44, %v887_v39  ;;  %v684_v62 = vmax.f32 %v630_v46, 0.0  ;;  %v5795_v7 = vpack.c.bf16 %v817_v58, %v817_v58  ;;  %v2607_v10 = vld [vmem:[#allocation2 + $0xe8] sm:$0x3] }
 0x10e   : > { %v900_v61 = vsel %vm840_vm4, %v5778_v45, %v899_v40  ;;  %v5791_v63 = vpack.c.bf16 %v816_v57, %v815_v56  ;;  %4819 = vmatmul.mubr.msk.bf16.gmra.mrb[20].mxu1 %vm692_vm2, %v888_v60  ;;  %775 = vst.msk [vmem:[#allocation2 + $0x151] sm:$0xff] %vm692_vm2, %v686_v51  ;;  %v687_v5 = vmax.f32 %v641_v53, 0.0  ;;  %v685_v6 = vmax.f32 %v633_v55, 0.0 }
 0x10f   : > { %v5797_v8 = vpack.c.bf16 %v820_v50, %v820_v50  ;;  %4822 = vmatprep.mubr.msk.bf16.mxu1 %vm692_vm2, %v900_v61  ;;  %773 = vst.msk [vmem:[#allocation2 + $0x139] sm:$0xff] %vm692_vm2, %v684_v62  ;;  %v914_v15 = vshrl.u32 %v5784_v59, 16  ;;  %v916_v16 = vshll.u32 %v5784_v59, 16  ;;  %v4810_v19 = vpop.f32.mrb[12].mxu1  ;;  %v909_v20 = vshll.u32 %v5795_v7, 16  ;;  %v2608_v62 = vld [vmem:[#allocation2 + $0xf0] sm:$0xff] }
 0x110   : > { %v902_v11 = vshrl.u32 %v5791_v63, 16  ;;  %v904_v14 = vshll.u32 %v5791_v63, 16  ;;  %776 = vst.msk [vmem:[#allocation2 + $0x159] sm:$0xff] %vm692_vm2, %v687_v5  ;;  %774 = vst.msk [vmem:[#allocation2 + $0x141] sm:$0xff] %vm692_vm2, %v685_v6  ;;  %v654_v23 = vadd.f32 %v4810_v19, %v5682_v37  ;;  %v645_v3 = vpop.f32.mrb[13].mxu1  ;;  %v5810_v24 = vpack.c.bf16 %v2606_v1, %v2605_v0  ;;  %v2609_v0 = vld [vmem:[#allocation2 + $0xf8] sm:$0xff] }
 0x111   : > { %v921_v2 = vshll.u32 %v5797_v8, 16  ;;  %v918_v28 = vrot.slane %v916_v16, 1  ;;  %v646_v29 = vadd.f32 %v5682_v37, %v645_v3  ;;  %v4811_v30 = vpop.f32.mrb[14].mxu1  ;;  %v5813_v31 = vpack.c.bf16 %v2607_v10, %v2607_v10  ;;  %v2602_v43 = vld [vmem:[#allocation2 + $0xc0] sm:$0xff] }
 0x112   : > { %v906_v26 = vrot.slane %v904_v14, 1  ;;  %v911_v32 = vrot.slane %v909_v20, 1  ;;  %v690_v34 = vmax.f32 %v654_v23, 0.0  ;;  %v657_v35 = vadd.f32 %v4811_v30, %v5682_v37  ;;  %v648_v38 = vpop.f32.mrb[15].mxu1  ;;  %v821_v53 = vld [vmem:[#allocation2 + $0xa8] sm:$0xff] }
 0x113   : > { %v923_v33 = vrot.slane %v921_v2, 1  ;;  %v5818_v40 = vor.u32 %v918_v28, %v914_v15  ;;  %v688_v41 = vmax.f32 %v646_v29, 0.0  ;;  %v649_v42 = vadd.f32 %v5682_v37, %v648_v38  ;;  %v2603_v46 = vld [vmem:[#allocation2 + $0xc8] sm:$0xff]  ;;  %v2604_v47 = vld [vmem:[#allocation2 + $0xd0] sm:$0x3]  ;;  %v2614_v29 = vld [vmem:[#allocation2 + $0x120] sm:$0xff] }
 0x114   : > { %v5816_v39 = vor.u32 %v906_v26, %v902_v11  ;;  %779 = vst.msk [vmem:[#allocation2 + $0x181] sm:$0xff] %vm692_vm2, %v690_v34  ;;  %v691_v49 = vmax.f32 %v657_v35, 0.0  ;;  %v5822_v50 = vpack.c.bf16 %v2603_v46, %v2602_v43  ;;  %v5824_v51 = vpack.c.bf16 %v2604_v47, %v2604_v47  ;;  %v822_v55 = vld [vmem:[#allocation2 + $0xb0] sm:$0xff]  ;;  %v823_v56 = vld [vmem:[#allocation2 + $0xb8] sm:$0x3]  ;;  %v2611_v26 = vld [vmem:[#allocation2 + $0x108] sm:$0xff] }
 0x115   : > { %v2655_v57 = vshrl.u32 %v5810_v24, 16  ;;  %v924_v37 = vsel %vm840_vm4, %v5818_v40, %v923_v33  ;;  %777 = vst.msk [vmem:[#allocation2 + $0x169] sm:$0xff] %vm692_vm2, %v688_v41  ;;  %v689_v60 = vmax.f32 %v649_v42, 0.0  ;;  %v5832_v61 = vpack.c.bf16 %v822_v55, %v821_v53  ;;  %v2610_v11 = vld [vmem:[#allocation2 + $0x100] sm:$0x3]  ;;  %v2612_v28 = vld [vmem:[#allocation2 + $0x110] sm:$0xff] }
 0x116   : > { %v912_v58 = vsel %vm840_vm4, %v5816_v39, %v911_v32  ;;  %780 = vst.msk [vmem:[#allocation2 + $0x189] sm:$0xff] %vm692_vm2, %v691_v49  ;;  %v2643_v1 = vshrl.u32 %v5822_v50, 16  ;;  %v2645_v5 = vshll.u32 %v5822_v50, 16  ;;  %v2650_v6 = vshll.u32 %v5824_v51, 16  ;;  %v2613_v35 = vld [vmem:[#allocation2 + $0x118] sm:$0x3] }
 0x117   : > { %4823 = vmatmul.mubr.msk.bf16.gmra.mrb[24].mxu1 %vm692_vm2, %v912_v58  ;;  %v5839_v10 = vpack.c.bf16 %v823_v56, %v823_v56  ;;  %778 = vst.msk [vmem:[#allocation2 + $0x171] sm:$0xff] %vm692_vm2, %v689_v60  ;;  %v926_v14 = vshrl.u32 %v5832_v61, 16  ;;  %v928_v15 = vshll.u32 %v5832_v61, 16  ;;  %v2657_v16 = vshll.u32 %v5810_v24, 16  ;;  %v2615_v38 = vld [vmem:[#allocation2 + $0x128] sm:$0xff] }
 0x118   : > { %4826 = vmatprep.mubr.msk.bf16.mxu1 %vm692_vm2, %v924_v37  ;;  %v2662_v19 = vshll.u32 %v5813_v31, 16  ;;  %v2647_v20 = vrot.slane %v2645_v5, 1  ;;  %v2652_v2 = vrot.slane %v2650_v6, 1  ;;  %v5848_v3 = vpack.c.bf16 %v2609_v0, %v2608_v62  ;;  %v2616_v56 = vld [vmem:[#allocation2 + $0x130] sm:$0x3]  ;;  %v2617_v0 = vld [vmem:[#allocation2 + $0x138] sm:$0xff] }
 0x119   : > { %v933_v23 = vshll.u32 %v5839_v10, 16  ;;  %v930_v30 = vrot.slane %v928_v15, 1  ;;  %v2659_v32 = vrot.slane %v2657_v16, 1  ;;  %v5850_v34 = vpack.c.bf16 %v2610_v11, %v2610_v11 }
 0x11a   : > { %v2664_v33 = vrot.slane %v2662_v19, 1  ;;  %v5852_v41 = vor.u32 %v2647_v20, %v2643_v1  ;;  %v2667_v43 = vshrl.u32 %v5848_v3, 16  ;;  %v2669_v46 = vshll.u32 %v5848_v3, 16  ;;  %v2618_v1 = vld [vmem:[#allocation2 + $0x140] sm:$0xff]  ;;  %v2619_v20 = vld [vmem:[#allocation2 + $0x148] sm:$0x3] }
 0x11b   : > { %v935_v42 = vrot.slane %v933_v23, 1  ;;  %v5856_v47 = vor.u32 %v930_v30, %v926_v14  ;;  %v5858_v49 = vor.u32 %v2659_v32, %v2655_v57  ;;  %v2674_v53 = vshll.u32 %v5850_v34, 16  ;;  %v2622_v30 = vld [vmem:[#allocation2 + $0x160] sm:$0x3] }
 0x11c   : > { %v5861_v55 = vpack.c.bf16 %v2612_v28, %v2611_v26  ;;  %v2653_v58 = vsel %vm840_vm4, %v5852_v41, %v2652_v2  ;;  %v2671_v37 = vrot.slane %v2669_v46, 1  ;;  %v5865_v60 = vpack.c.bf16 %v2613_v35, %v2613_v35  ;;  %v2620_v28 = vld [vmem:[#allocation2 + $0x150] sm:$0xff] }
 0x11d   : > { %v5867_v62 = vpack.c.bf16 %v2615_v38, %v2614_v29  ;;  %4976 = vmatprep.mubr.msk.bf16.mxu0 %vm692_vm2, %v2653_v58  ;;  %v936_v57 = vsel %vm840_vm4, %v5856_v47, %v935_v42  ;;  %v2665_v5 = vsel %vm840_vm4, %v5858_v49, %v2664_v33  ;;  %v2676_v6 = vrot.slane %v2674_v53, 1  ;;  %v2621_v29 = vld [vmem:[#allocation2 + $0x158] sm:$0xff] }
 0x11e   : > { %v2679_v11 = vshrl.u32 %v5861_v55, 16  ;;  %4977 = vmatmul.mubr.msk.bf16.vlgmr.msra.gmra.mrb[16].mxu0 %vm692_vm2, %v2665_v5  ;;  %v5877_v14 = vor.u32 %v2671_v37, %v2667_v43  ;;  %v2681_v15 = vshll.u32 %v5861_v55, 16  ;;  %v2686_v16 = vshll.u32 %v5865_v60, 16  ;;  %v2623_v37 = vld [vmem:[#allocation2 + $0x168] sm:$0xff] }
 0x11f   : > { %4827 = vmatmul.mubr.msk.bf16.gmra.mrb[28].mxu1 %vm692_vm2, %v936_v57  ;;  %v5881_v19 = vpack.c.bf16 %v2616_v56, %v2616_v56  ;;  %4993 = vmatpush3.bf16.msra.mxu0 %v5675_v36  ;;  %v2691_v2 = vshrl.u32 %v5867_v62, 16  ;;  %v2693_v23 = vshll.u32 %v5867_v62, 16  ;;  %v5888_v26 = vpack.c.bf16 %v2618_v1, %v2617_v0  ;;  %v2624_v0 = vld [vmem:[#allocation2 + $0x170] sm:$0xff] }
 0x120   : > { %4832 = vmatprep.mubr.msk.bf16.mxu1 %vm692_vm2, %v5660_v25  ;;  %v2677_v32 = vsel %vm840_vm4, %v5877_v14, %v2676_v6  ;;  %v2683_v33 = vrot.slane %v2681_v15, 1  ;;  %5010 = vmatprep.subr.bf16.mxu0 %v5734_v52  ;;  %v2688_v36 = vrot.slane %v2686_v16, 1  ;;  %v5895_v42 = vpack.c.bf16 %v2619_v20, %v2619_v20  ;;  %v5916_v20 = vld [vmem:[%s6666_s5 + $0x18] sm:$0xff]  }
 0x121   : > { %v2698_v35 = vshll.u32 %v5881_v19, 16  ;;  %4980 = vmatprep.mubr.msk.bf16.mxu0 %vm692_vm2, %v2677_v32  ;;  %v2695_v38 = vrot.slane %v2693_v23, 1  ;;  %v2705_v43 = vshll.u32 %v5888_v26, 16  ;;  %v5900_v56 = vpack.c.bf16 %v2621_v29, %v2620_v28 }
 0x122   : > { %v5898_v46 = vor.u32 %v2683_v33, %v2679_v11  ;;  %v5902_v58 = vpack.c.bf16 %v2622_v30, %v2622_v30  ;;  %v2703_v57 = vshrl.u32 %v5888_v26, 16  ;;  %v2710_v11 = vshll.u32 %v5895_v42, 16  ;;  %v2625_v30 = vld [vmem:[#allocation2 + $0x178] sm:$0x3] }
 0x123   : > { %v2700_v53 = vrot.slane %v2698_v35, 1  ;;  %v5904_v1 = vor.u32 %v2695_v38, %v2691_v2  ;;  %v2717_v5 = vshll.u32 %v5900_v56, 16  ;;  %v2707_v15 = vrot.slane %v2705_v43, 1 }
 0x124   : > { %v2689_v6 = vsel %vm840_vm4, %v5898_v46, %v2688_v36  ;;  %v5911_v16 = vpack.c.bf16 %v2624_v0, %v2623_v37  ;;  %v2715_v23 = vshrl.u32 %v5900_v56, 16  ;;  %v2722_v29 = vshll.u32 %v5902_v58, 16 }
 0x125   : > { %v2701_v2 = vsel %vm840_vm4, %v5904_v1, %v2700_v53  ;;  %v2719_v28 = vrot.slane %v2717_v5, 1  ;;  %v5929_v32 = vor.u32 %v2707_v15, %v2703_v57  ;;  %v2712_v33 = vrot.slane %v2710_v11, 1 }
 0x126   : > { %4981 = vmatmul.mubr.msk.bf16.gmra.mrb[20].mxu0 %vm692_vm2, %v2689_v6  ;;  %v5931_v35 = vpack.c.bf16 %v2625_v30, %v2625_v30  ;;  %v2729_v36 = vshll.u32 %v5911_v16, 16  ;;  %v2724_v43 = vrot.slane %v2722_v29, 1  ;;  %v2727_v37 = vshrl.u32 %v5911_v16, 16 }
 0x127   : > { %4833 = vmatmul.mubr.msk.bf16.vlgmr.msra.gmra.mrb[16].mxu1 %vm692_vm2, %v5710_v21  ;;  %4984 = vmatprep.mubr.msk.bf16.mxu0 %vm692_vm2, %v2701_v2  ;;  %v5935_v38 = vor.u32 %v2719_v28, %v2715_v23  ;;  %v2713_v53 = vsel %vm840_vm4, %v5929_v32, %v2712_v33  ;;  %v1200_v2 = vrot.slane %v5660_v25, 1  ;;  %v1201_v23 = vrot.slane %v5662_v27, 1 }
 0x128   : > { %4836 = vmatprep.mubr.msk.bf16.mxu1 %vm692_vm2, %v5704_v17  ;;  %4849 = vmatpush3.bf16.msra.mxu1 %v5734_v52  ;;  %v2731_v0 = vrot.slane %v2729_v36, 1  ;;  %v2734_v5 = vshll.u32 %v5931_v35, 16  ;;  %v1203_v25 = vrot.slane %v5710_v21, 1  ;;  %v1204_v27 = vrot.slane %v5712_v22, 1 }
 0x129   : > { %4866 = vmatprep.subr.bf16.mxu1 %v5916_v20  ;;  %v2725_v57 = vsel %vm840_vm4, %v5935_v38, %v2724_v43  ;;  %v1202_v28 = vsel %vm1199_vm5, %v1200_v2, %v1201_v23  ;;  %v1206_v29 = vrot.slane %v5704_v17, 1  ;;  %v1207_v30 = vrot.slane %v5706_v18, 1 }
 0x12a   : > { %v5949_v6 = vor.u32 %v2731_v0, %v2727_v37  ;;  %v2736_v15 = vrot.slane %v2734_v5, 1  ;;  %v1205_v33 = vsel %vm1199_vm5, %v1203_v25, %v1204_v27  ;;  %v1209_v18 = vrot.slane %v5749_v9, 1 }
 0x12b   : > { %v1208_v22 = vsel %vm1199_vm5, %v1206_v29, %v1207_v30  ;;  %v1210_v36 = vrot.slane %v5755_v12, 1  ;;  %v1212_v43 = vrot.slane %v5744_v4, 1  ;;  %v1215_v12 = vrot.slane %v5791_v63, 1 }
 0x12c   : > { %v2737_v11 = vsel %vm840_vm4, %v5949_v6, %v2736_v15  ;;  %v1218_v5 = vrot.slane %v5784_v59, 1  ;;  %v6669_v15 = vrot.slane %v5822_v50, 1  ;;  %v1222_v23 = vrot.slane %v5839_v10, 1 }
 0x12d   : > { %v1211_v37 = vsel %vm1199_vm5, %v1209_v18, %v1210_v36  ;;  %v2992_v27 = vrot.slane %v5813_v31, 1  ;;  %v6036_v30 = vrot.slane %v5848_v3, 1  ;;  %v6055_v10 = vrot.slane %v5861_v55, 1 }
 0x12e   : > { %4985 = vmatmul.mubr.msk.bf16.gmra.mrb[24].mxu0 %vm692_vm2, %v2713_v53  ;;  %v1213_v53 = vrot.slane %v5757_v13, 1  ;;  %v1216_v13 = vrot.slane %v5795_v7, 1 }
 0x12f   : > { %4837 = vmatmul.mubr.msk.bf16.gmra.mrb[20].mxu1 %vm692_vm2, %v5749_v9  ;;  %4988 = vmatprep.mubr.msk.bf16.mxu0 %vm692_vm2, %v2725_v57  ;;  %v1219_v57 = vrot.slane %v5797_v8, 1 }
 0x130   : > { %4840 = vmatprep.mubr.msk.bf16.mxu1 %vm692_vm2, %v5744_v4  ;;  %v1214_v0 = vsel %vm1199_vm5, %v1212_v43, %v1213_v53  ;;  %v1217_v2 = vsel %vm1199_vm5, %v1215_v12, %v1216_v13  ;;  %v6059_v53 = vrot.slane %v5867_v62, 1  ;;  %v3004_v13 = vrot.slane %v5895_v42, 1 }
 0x131   : > { %v1220_v7 = vsel %vm1199_vm5, %v1218_v5, %v1219_v57  ;;  %v6084_v57 = vrot.slane %v5900_v56, 1  ;;  %v6098_v42 = vrot.slane %v5911_v16, 1 }
 0x136   : > { %4989 = vmatmul.mubr.msk.bf16.gmra.mrb[28].mxu0 %vm692_vm2, %v2737_v11  ;;  %v2989_v11 = vrot.slane %v5824_v51, 1  ;;  %v6671_v51 = vrot.slane %v5832_v61, 1 }
 0x137   : > { %4841 = vmatmul.mubr.msk.bf16.gmra.mrb[24].mxu1 %vm692_vm2, %v5791_v63  ;;  %4994 = vmatprep.mubr.msk.bf16.mxu0 %vm692_vm2, %v5822_v50 }
 0x138   : > { %4844 = vmatprep.mubr.msk.bf16.mxu1 %vm692_vm2, %v5784_v59  ;;  %v2990_v8 = vsel %vm1199_vm5, %v6669_v15, %v2989_v11  ;;  %v3007_v11 = vrot.slane %v5902_v58, 1  ;;  %v3010_v58 = vrot.slane %v5931_v35, 1  ;;  %v1372_v35 = vld [vmem:[#allocation2 + $0x40] sm:$0x3] }
 0x13e   : > { %4995 = vmatmul.mubr.msk.bf16.vlgmr.msra.gmra.mrb[16].mxu0 %vm692_vm2, %v5810_v24 }
 0x13f   : > { %4845 = vmatmul.mubr.msk.bf16.gmra.mrb[28].mxu1 %vm692_vm2, %v5832_v61  ;;  %5011 = vmatpush3.bf16.msra.mxu0 %v5734_v52  ;;  %v5982_v52 = vld [vmem:[%s6666_s5 + $0x20] sm:$0xff]  }
 0x140   : > { %4998 = vmatprep.mubr.msk.bf16.mxu0 %vm692_vm2, %v5848_v3  ;;  %4850 = vmatprep.mubr.msk.bf16.mxu1 %vm692_vm2, %v1202_v28  ;;  %v6670_v28 = vrot.slane %v5810_v24, 1 }
 0x141   : > { %5028 = vmatprep.subr.bf16.mxu0 %v5916_v20 }
 0x142   : > { %v2993_v36 = vsel %vm1199_vm5, %v6670_v28, %v2992_v27  ;;  %v3011_v27 = vsel %vm1199_vm5, %v6098_v42, %v3010_v58 }
 0x146   : > { %4999 = vmatmul.mubr.msk.bf16.gmra.mrb[20].mxu0 %vm692_vm2, %v5861_v55 }
 0x147   : > { %4851 = vmatmul.mubr.msk.bf16.vlgmr.msra.gmra.mrb[16].mxu1 %vm692_vm2, %v1205_v33  ;;  %5002 = vmatprep.mubr.msk.bf16.mxu0 %vm692_vm2, %v5867_v62  ;;  %v2995_v33 = vrot.slane %v5850_v34, 1  ;;  %v2998_v34 = vrot.slane %v5865_v60, 1 }
 0x148   : > { %4854 = vmatprep.mubr.msk.bf16.mxu1 %vm692_vm2, %v1208_v22  ;;  %4867 = vmatpush3.bf16.msra.mxu1 %v5916_v20  ;;  %v1223_v22 = vsel %vm1199_vm5, %v6671_v51, %v1222_v23 }
 0x149   : > { %4884 = vmatprep.subr.bf16.mxu1 %v5982_v52  ;;  %v2996_v31 = vsel %vm1199_vm5, %v6036_v30, %v2995_v33 }
 0x14e   : > { %5003 = vmatmul.mubr.msk.bf16.gmra.mrb[24].mxu0 %vm692_vm2, %v5888_v26 }
 0x14f   : > { %4855 = vmatmul.mubr.msk.bf16.gmra.mrb[20].mxu1 %vm692_vm2, %v1211_v37  ;;  %5006 = vmatprep.mubr.msk.bf16.mxu0 %vm692_vm2, %v5900_v56  ;;  %v2999_v37 = vsel %vm1199_vm5, %v6055_v10, %v2998_v34 }
 0x150   : > { %4858 = vmatprep.mubr.msk.bf16.mxu1 %vm692_vm2, %v1214_v0  ;;  %v6067_v0 = vld [vmem:[%s6666_s5 + $0x28] sm:$0xff]  }
 0x156   : > { %5007 = vmatmul.mubr.msk.bf16.gmra.mrb[28].mxu0 %vm692_vm2, %v5911_v16 }
 0x157   : > { %4859 = vmatmul.mubr.msk.bf16.gmra.mrb[24].mxu1 %vm692_vm2, %v1217_v2  ;;  %5012 = vmatprep.mubr.msk.bf16.mxu0 %vm692_vm2, %v2990_v8  ;;  %v1369_v8 = vld [vmem:[#allocation2 + $0x28] sm:$0x3] }
 0x158   : > { %4862 = vmatprep.mubr.msk.bf16.mxu1 %vm692_vm2, %v1220_v7  ;;  %v3008_v7 = vsel %vm1199_vm5, %v6084_v57, %v3007_v11  ;;  %v6101_v23 = vpack.c.bf16 %v1369_v8, %v1369_v8  ;;  %v1381_v11 = vld [vmem:[#allocation2 + $0x88] sm:$0x3]  ;;  %v6139_v8 = vld [vmem:[%s6666_s5 + $0x30] sm:$0xff]  }
 0x15a   : > { %v1557_v33 = vshll.u32 %v6101_v23, 16 }
 0x15e   : > { %5013 = vmatmul.mubr.msk.bf16.vlgmr.msra.gmra.mrb[16].mxu0 %vm692_vm2, %v2993_v36  ;;  %v6113_v36 = vpack.c.bf16 %v1372_v35, %v1372_v35 }
 0x15f   : > { %4863 = vmatmul.mubr.msk.bf16.gmra.mrb[28].mxu1 %vm692_vm2, %v1223_v22  ;;  %5029 = vmatpush3.bf16.msra.mxu0 %v5916_v20  ;;  %v3001_v20 = vrot.slane %v5881_v19, 1  ;;  %v6079_v19 = vrot.slane %v5888_v26, 1  ;;  %v1375_v22 = vld [vmem:[#allocation2 + $0x58] sm:$0x3] }
 0x160   : > { %4868 = vmatprep.mubr.msk.bf16.mxu1 %vm692_vm2, %v5710_v21  ;;  %5016 = vmatprep.mubr.msk.bf16.mxu0 %vm692_vm2, %v2996_v31  ;;  %v1559_v31 = vrot.slane %v1557_v33, 1  ;;  %v6115_v34 = vpack.c.bf16 %v1375_v22, %v1375_v22  ;;  %v3152_v33 = vld [vmem:[#allocation2 + $0xe8] sm:$0x3]  ;;  %v1384_v22 = vld [vmem:[#allocation2 + $0xa0] sm:$0x3] }
 0x161   : > { %5046 = vmatprep.subr.bf16.mxu0 %v5982_v52  ;;  %v3002_v60 = vsel %vm1199_vm5, %v6059_v53, %v3001_v20  ;;  %v3005_v2 = vsel %vm1199_vm5, %v6079_v19, %v3004_v13  ;;  %v1378_v13 = vld [vmem:[#allocation2 + $0x70] sm:$0x3] }
 0x162   : > { %v1560_v20 = vsel %vm840_vm4, %v5737_v54, %v1559_v31  ;;  %v6132_v54 = vpack.c.bf16 %v1381_v11, %v1381_v11  ;;  %v1387_v31 = vld [vmem:[#allocation2 + $0xb8] sm:$0x3] }
 0x164   : > { %v1601_v35 = vshll.u32 %v6132_v54, 16 }
 0x166   : > { %5017 = vmatmul.mubr.msk.bf16.gmra.mrb[20].mxu0 %vm692_vm2, %v2999_v37  ;;  %v1568_v37 = vshll.u32 %v6113_v36, 16 }
 0x167   : > { %4869 = vmatmul.mubr.msk.bf16.vlgmr.msra.gmra.mrb[16].mxu1 %vm692_vm2, %v5704_v17  ;;  %5020 = vmatprep.mubr.msk.bf16.mxu0 %vm692_vm2, %v3002_v60  ;;  %v1579_v60 = vshll.u32 %v6115_v34, 16 }
 0x168   : > { %4872 = vmatprep.mubr.msk.bf16.mxu1 %vm692_vm2, %v5749_v9  ;;  %4885 = vmatpush3.bf16.msra.mxu1 %v5982_v52 }
 0x169   : > { %4902 = vmatprep.subr.bf16.mxu1 %v6067_v0  ;;  %v1581_v58 = vrot.slane %v1579_v60, 1  ;;  %v1603_v60 = vrot.slane %v1601_v35, 1  ;;  %v3171_v35 = vld [vmem:[#allocation2 + $0x180] sm:$0xff] }
 0x16e   : > { %5021 = vmatmul.mubr.msk.bf16.gmra.mrb[24].mxu0 %vm692_vm2, %v3005_v2  ;;  %v1570_v2 = vrot.slane %v1568_v37, 1 }
 0x16f   : > { %4873 = vmatmul.mubr.msk.bf16.gmra.mrb[20].mxu1 %vm692_vm2, %v5744_v4  ;;  %5024 = vmatprep.mubr.msk.bf16.mxu0 %vm692_vm2, %v3008_v7  ;;  %v6130_v7 = vpack.c.bf16 %v1378_v13, %v1378_v13  ;;  %v6157_v13 = vpack.c.bf16 %v1387_v31, %v1387_v31 }
 0x170   : > { %4876 = vmatprep.mubr.msk.bf16.mxu1 %vm692_vm2, %v5791_v63 }
 0x176   : > { %5025 = vmatmul.mubr.msk.bf16.gmra.mrb[28].mxu0 %vm692_vm2, %v3011_v27  ;;  %v1582_v27 = vsel %vm840_vm4, %v5776_v44, %v1581_v58  ;;  %v6155_v44 = vpack.c.bf16 %v1384_v22, %v1384_v22  ;;  %v3172_v22 = vld [vmem:[#allocation2 + $0x188] sm:$0xff] }
 0x177   : > { %4877 = vmatmul.mubr.msk.bf16.gmra.mrb[24].mxu1 %vm692_vm2, %v5784_v59  ;;  %5030 = vmatprep.mubr.msk.bf16.mxu0 %vm692_vm2, %v5810_v24 }
 0x178   : > { %4880 = vmatprep.mubr.msk.bf16.mxu1 %vm692_vm2, %v5832_v61 }
 0x17e   : > { %5031 = vmatmul.mubr.msk.bf16.vlgmr.msra.gmra.mrb[16].mxu0 %vm692_vm2, %v5848_v3 }
 0x17f   : > { %4881 = vmatmul.mubr.msk.bf16.gmra.mrb[28].mxu1 %vm692_vm2, %v5822_v50  ;;  %5047 = vmatpush3.bf16.msra.mxu0 %v5982_v52  ;;  %v1571_v52 = vsel %vm840_vm4, %v5727_v48, %v1570_v2  ;;  %v1590_v48 = vshll.u32 %v6130_v7, 16  ;;  %v1604_v2 = vsel %vm840_vm4, %v5816_v39, %v1603_v60 }
 0x180   : > { %4886 = vmatprep.mubr.msk.bf16.mxu1 %vm692_vm2, %v1560_v20  ;;  %5034 = vmatprep.mubr.msk.bf16.mxu0 %vm692_vm2, %v5861_v55  ;;  %v6153_v20 = vpack.c.bf16 %v3152_v33, %v3152_v33  ;;  %v3158_v33 = vld [vmem:[#allocation2 + $0x118] sm:$0x3] }
 0x181   : > { %5064 = vmatprep.subr.bf16.mxu0 %v6067_v0  ;;  %v1592_v37 = vrot.slane %v1590_v48, 1  ;;  %v1390_v48 = vld [vmem:[#allocation2 + $0xd0] sm:$0x3] }
 0x182   : > { %v3334_v58 = vshll.u32 %v6153_v20, 16  ;;  %v6174_v60 = vpack.c.bf16 %v1390_v48, %v1390_v48  ;;  %v3164_v48 = vld [vmem:[#allocation2 + $0x148] sm:$0x3] }
 0x183   : > { %v1593_v11 = vsel %vm840_vm4, %v5778_v45, %v1592_v37  ;;  %v1623_v45 = vshll.u32 %v6157_v13, 16 }
 0x184   : > { %v3336_v37 = vrot.slane %v3334_v58, 1  ;;  %v1819_v59 = vrot.slane %v6174_v60, 1 }
 0x185   : > { %v1625_v15 = vrot.slane %v1623_v45, 1 }
 0x186   : > { %5035 = vmatmul.mubr.msk.bf16.gmra.mrb[20].mxu0 %vm692_vm2, %v5867_v62 }
 0x187   : > { %4887 = vmatmul.mubr.msk.bf16.vlgmr.msra.gmra.mrb[16].mxu1 %vm692_vm2, %v1571_v52  ;;  %5038 = vmatprep.mubr.msk.bf16.mxu0 %vm692_vm2, %v5888_v26  ;;  %v3155_v52 = vld [vmem:[#allocation2 + $0x100] sm:$0x3]  ;;  %v1626_v58 = vsel %vm840_vm4, %v5856_v47, %v1625_v15 }
 0x188   : > { %4890 = vmatprep.mubr.msk.bf16.mxu1 %vm692_vm2, %v1582_v27  ;;  %4903 = vmatpush3.bf16.msra.mxu1 %v6067_v0  ;;  %v1612_v27 = vshll.u32 %v6155_v44, 16  ;;  %v6172_v31 = vpack.c.bf16 %v3155_v52, %v3155_v52  ;;  %v3337_v52 = vsel %vm840_vm4, %v5858_v49, %v3336_v37 }
 0x189   : > { %4920 = vmatprep.subr.bf16.mxu1 %v6139_v8 }
 0x18a   : > { %v1614_v39 = vrot.slane %v1612_v27, 1  ;;  %v3345_v51 = vshll.u32 %v6172_v31, 16  ;;  %v3161_v27 = vld [vmem:[#allocation2 + $0x130] sm:$0x3] }
 0x18c   : > { %v1615_v28 = vsel %vm840_vm4, %v5818_v40, %v1614_v39  ;;  %v1634_v40 = vshll.u32 %v6174_v60, 16 }
 0x18e   : > { %5039 = vmatmul.mubr.msk.bf16.gmra.mrb[24].mxu0 %vm692_vm2, %v5900_v56  ;;  %v1636_v47 = vrot.slane %v1634_v40, 1 }
 0x18f   : > { %4891 = vmatmul.mubr.msk.bf16.gmra.mrb[20].mxu1 %vm692_vm2, %v1593_v11  ;;  %5042 = vmatprep.mubr.msk.bf16.mxu0 %vm692_vm2, %v5911_v16  ;;  %v6176_v11 = vpack.c.bf16 %v3158_v33, %v3158_v33  ;;  %v6194_v33 = vpack.c.bf16 %v3161_v27, %v3161_v27  ;;  %v1801_v27 = vrot.slane %v6113_v36, 1  ;;  %v6231_v36 = vld [vmem:[%s6666_s5 + $0x38] sm:$0xff]  }
 0x190   : > { %4894 = vmatprep.mubr.msk.bf16.mxu1 %vm692_vm2, %v1604_v2  ;;  %v6178_v2 = vpack.c.bf16 %v3172_v22, %v3171_v35  ;;  %v1798_v35 = vrot.slane %v6101_v23, 1  ;;  %v6197_v22 = vpack.c.bf16 %v3164_v48, %v3164_v48  ;;  %v1637_v49 = vsel %vm840_vm4, %v5852_v41, %v1636_v47  ;;  %v3173_v47 = vld [vmem:[#allocation2 + $0x190] sm:$0x3] }
 0x191   : > { %v3356_v45 = vshll.u32 %v6176_v11, 16  ;;  %v3367_v39 = vshll.u32 %v6194_v33, 16  ;;  %v3578_v60 = vrot.slane %v6194_v33, 1 }
 0x192   : > { %v3378_v23 = vshll.u32 %v6197_v22, 16  ;;  %v3406_v9 = vshll.u32 %v6178_v2, 16 }
 0x193   : > { %v3358_v15 = vrot.slane %v3356_v45, 1  ;;  %v3369_v21 = vrot.slane %v3367_v39, 1 }
 0x194   : > { %v3380_v45 = vrot.slane %v3378_v23, 1 }
 0x195   : > { %v3359_v41 = vsel %vm840_vm4, %v5898_v46, %v3358_v15  ;;  %v1807_v15 = vrot.slane %v6130_v7, 1  ;;  %v3404_v7 = vshrl.u32 %v6178_v2, 16 }
 0x196   : > { %5043 = vmatmul.mubr.msk.bf16.gmra.mrb[28].mxu0 %vm692_vm2, %v6178_v2 }
 0x197   : > { %4895 = vmatmul.mubr.msk.bf16.gmra.mrb[24].mxu1 %vm692_vm2, %v1615_v28  ;;  %5048 = vmatprep.mubr.msk.bf16.mxu0 %vm692_vm2, %v3337_v52  ;;  %v3347_v28 = vrot.slane %v3345_v51, 1  ;;  %v1799_v51 = vsel %vm1199_vm5, %v1203_v25, %v1798_v35  ;;  %v3170_v52 = vld [vmem:[#allocation2 + $0x178] sm:$0x3]  ;;  %v1804_v25 = vrot.slane %v6115_v34, 1 }
 0x198   : > { %4898 = vmatprep.mubr.msk.bf16.mxu1 %vm692_vm2, %v1626_v58  ;;  %v3167_v58 = vld [vmem:[#allocation2 + $0x160] sm:$0x3]  ;;  %v6220_v48 = vpack.c.bf16 %v3170_v52, %v3170_v52 }
 0x199   : > { %v3348_v37 = vsel %vm840_vm4, %v5877_v14, %v3347_v28  ;;  %v6217_v40 = vpack.c.bf16 %v3167_v58, %v3167_v58  ;;  %v3370_v28 = vsel %vm840_vm4, %v5904_v1, %v3369_v21  ;;  %v1805_v17 = vsel %vm1199_vm5, %v1209_v18, %v1804_v25 }
 0x19a   : > { %v3400_v34 = vshll.u32 %v6220_v48, 16  ;;  %v1810_v18 = vrot.slane %v6132_v54, 1  ;;  %v3408_v58 = vrot.slane %v3406_v9, 1  ;;  %v1816_v21 = vrot.slane %v6157_v13, 1 }
 0x19b   : > { %v3389_v35 = vshll.u32 %v6217_v40, 16  ;;  %v3569_v25 = vrot.slane %v6153_v20, 1  ;;  %v1966_v20 = vld [vmem:[#allocation2 + $0x38] sm:$0xff] }
 0x19c   : > { %v3402_v39 = vrot.slane %v3400_v34, 1  ;;  %v1811_v54 = vsel %vm1199_vm5, %v1215_v12, %v1810_v18  ;;  %v6267_v52 = vor.u32 %v3408_v58, %v3404_v7  ;;  %v3581_v34 = vrot.slane %v6197_v22, 1  ;;  %v6316_v18 = vld [vmem:[%s6666_s5 + $0x40] sm:$0xff]   ;;  %v1974_v7 = vld [vmem:[#allocation2 + $0x78] sm:$0xff] }
 0x19d   : > { %v1975_v22 = vld [vmem:[#allocation2 + $0x80] sm:$0xff] }
 0x19e   : > { %5049 = vmatmul.mubr.msk.bf16.vlgmr.msra.gmra.mrb[16].mxu0 %vm692_vm2, %v3348_v37  ;;  %v6245_v37 = vpack.c.bf16 %v3173_v47, %v3173_v47  ;;  %v3403_v4 = vsel %vm840_vm4, %v5949_v6, %v3402_v39  ;;  %v1968_v47 = vld [vmem:[#allocation2 + $0x48] sm:$0xff]  ;;  %v3582_v33 = vsel %vm1199_vm5, %v6079_v19, %v3581_v34  ;;  %v3584_v39 = vrot.slane %v6217_v40, 1 }
 0x19f   : > { %4899 = vmatmul.mubr.msk.bf16.gmra.mrb[28].mxu1 %vm692_vm2, %v1637_v49  ;;  %5065 = vmatpush3.bf16.msra.mxu0 %v6067_v0  ;;  %v1802_v0 = vsel %vm1199_vm5, %v1206_v29, %v1801_v27  ;;  %v3381_v29 = vsel %vm840_vm4, %v5929_v32, %v3380_v45  ;;  %v3391_v49 = vrot.slane %v3389_v35, 1  ;;  %v1965_v35 = vld [vmem:[#allocation2 + $0x30] sm:$0xff]  ;;  %v6330_v58 = vpack.c.bf16 %v1975_v22, %v1974_v7 }
 0x1a0   : > { %4904 = vmatprep.mubr.msk.bf16.mxu1 %vm692_vm2, %v1799_v51  ;;  %5052 = vmatprep.mubr.msk.bf16.mxu0 %vm692_vm2, %v3359_v41  ;;  %v1808_v51 = vsel %vm1199_vm5, %v1212_v43, %v1807_v15  ;;  %v3411_v41 = vshll.u32 %v6245_v37, 16  ;;  %v1813_v43 = vrot.slane %v6155_v44, 1  ;;  %v6672_v44 = vrot.slane %v5832_v61, 1 }
 0x1a1   : > { %5082 = vmatprep.subr.bf16.mxu0 %v6139_v8  ;;  %v3392_v23 = vsel %vm840_vm4, %v5935_v38, %v3391_v49  ;;  %v6674_v61 = vrot.slane %v5822_v50, 1  ;;  %v1969_v50 = vld [vmem:[#allocation2 + $0x50] sm:$0xff]  ;;  %v3579_v49 = vsel %vm1199_vm5, %v6059_v53, %v3578_v60  ;;  %v2183_v7 = vshll.u32 %v6330_v58, 16 }
 0x1a2   : > { %v3413_v27 = vrot.slane %v3411_v41, 1  ;;  %v1814_v63 = vsel %vm1199_vm5, %v1218_v5, %v1813_v43  ;;  %v1817_v45 = vsel %vm1199_vm5, %v6672_v44, %v1816_v21  ;;  %v3572_v5 = vrot.slane %v6172_v31, 1  ;;  %v1977_v41 = vld [vmem:[#allocation2 + $0x90] sm:$0xff]  ;;  %v1967_v21 = vld [vmem:[#allocation2 + $0x40] sm:$0x3] }
 0x1a3   : > { %v6307_v15 = vpack.c.bf16 %v1969_v50, %v1968_v47  ;;  %v3589_v43 = vrot.slane %v6178_v2, 1 }
 0x1a4   : > { %v3414_v12 = vsel %vm840_vm4, %v6267_v52, %v3413_v27  ;;  %v3590_v27 = vrot.slane %v6245_v37, 1 }
 0x1a6   : > { %5053 = vmatmul.mubr.msk.bf16.gmra.mrb[20].mxu0 %vm692_vm2, %v3370_v28  ;;  %v3575_v28 = vrot.slane %v6176_v11, 1  ;;  %v1972_v11 = vld [vmem:[#allocation2 + $0x68] sm:$0xff] }
 0x1a7   : > { %4905 = vmatmul.mubr.msk.bf16.vlgmr.msra.gmra.mrb[16].mxu1 %vm692_vm2, %v1802_v0  ;;  %5056 = vmatprep.mubr.msk.bf16.mxu0 %vm692_vm2, %v3381_v29  ;;  %v6673_v0 = vrot.slane %v5810_v24, 1  ;;  %v3573_v24 = vsel %vm1199_vm5, %v6036_v30, %v3572_v5  ;;  %v6294_v29 = vpack.c.bf16 %v1966_v20, %v1965_v35  ;;  %v1986_v35 = vld [vmem:[#allocation2 + $0xd8] sm:$0xff] }
 0x1a8   : > { %4908 = vmatprep.mubr.msk.bf16.mxu1 %vm692_vm2, %v1805_v17  ;;  %4921 = vmatpush3.bf16.msra.mxu1 %v6139_v8  ;;  %v1820_v17 = vsel %vm1199_vm5, %v6674_v61, %v1819_v59  ;;  %v3576_v31 = vsel %vm1199_vm5, %v6055_v10, %v3575_v28  ;;  %v1970_v28 = vld [vmem:[#allocation2 + $0x58] sm:$0x3]  ;;  %v1987_v61 = vld [vmem:[#allocation2 + $0xe0] sm:$0xff] }
 0x1a9   : > { %4938 = vmatprep.subr.bf16.mxu1 %v6231_v36  ;;  %v3570_v13 = vsel %vm1199_vm5, %v6673_v0, %v3569_v25  ;;  %v1984_v25 = vld [vmem:[#allocation2 + $0xc8] sm:$0xff]  ;;  %v6349_v0 = vpack.c.bf16 %v1967_v21, %v1967_v21  ;;  %v2148_v5 = vshrl.u32 %v6294_v29, 16  ;;  %v6367_v60 = vpack.c.bf16 %v1970_v28, %v1970_v28  ;;  %v1982_v28 = vld [vmem:[#allocation2 + $0xb8] sm:$0x3] }
 0x1ab   : > { %v2155_v20 = vshll.u32 %v6349_v0, 16  ;;  %v2166_v22 = vshll.u32 %v6367_v60, 16 }
 0x1ad   : > { %v2157_v34 = vrot.slane %v2155_v20, 1 }
 0x1ae   : > { %5057 = vmatmul.mubr.msk.bf16.gmra.mrb[24].mxu0 %vm692_vm2, %v3392_v23  ;;  %v3587_v23 = vrot.slane %v6220_v48, 1  ;;  %v1981_v48 = vld [vmem:[#allocation2 + $0xb0] sm:$0xff] }
 0x1af   : > { %4909 = vmatmul.mubr.msk.bf16.gmra.mrb[20].mxu1 %vm692_vm2, %v1808_v51  ;;  %5060 = vmatprep.mubr.msk.bf16.mxu0 %vm692_vm2, %v3403_v4  ;;  %v1978_v51 = vld [vmem:[#allocation2 + $0x98] sm:$0xff] }
 0x1b0   : > { %4912 = vmatprep.mubr.msk.bf16.mxu1 %vm692_vm2, %v1811_v54  ;;  %v3585_v54 = vsel %vm1199_vm5, %v6084_v57, %v3584_v39  ;;  %v6334_v4 = vpack.c.bf16 %v1978_v51, %v1977_v41  ;;  %v3588_v40 = vsel %vm1199_vm5, %v6098_v42, %v3587_v23  ;;  %v1976_v23 = vld [vmem:[#allocation2 + $0x88] sm:$0x3] }
 0x1b6   : > { %5061 = vmatmul.mubr.msk.bf16.gmra.mrb[28].mxu0 %vm692_vm2, %v3414_v12  ;;  %v1980_v12 = vld [vmem:[#allocation2 + $0xa8] sm:$0xff] }
 0x1b7   : > { %4913 = vmatmul.mubr.msk.bf16.gmra.mrb[24].mxu1 %vm692_vm2, %v1814_v63  ;;  %5066 = vmatprep.mubr.msk.bf16.mxu0 %vm692_vm2, %v3570_v13  ;;  %v2150_v63 = vshll.u32 %v6294_v29, 16  ;;  %v6347_v44 = vpack.c.bf16 %v1981_v48, %v1980_v12  ;;  %v3591_v13 = vsel %vm1199_vm5, %v3589_v43, %v3590_v27  ;;  %v6389_v48 = vpack.c.bf16 %v1976_v23, %v1976_v23  ;;  %v3735_v23 = vld [vmem:[#allocation2 + $0x118] sm:$0x3] }
 0x1b8   : > { %4916 = vmatprep.mubr.msk.bf16.mxu1 %vm692_vm2, %v1817_v45  ;;  %v1983_v45 = vld [vmem:[#allocation2 + $0xc0] sm:$0xff] }
 0x1b9   : > { %v6354_v59 = vpack.c.bf16 %v1984_v25, %v1983_v45  ;;  %v2152_v37 = vrot.slane %v2150_v63, 1  ;;  %v2185_v25 = vrot.slane %v2183_v7, 1  ;;  %v2181_v45 = vshrl.u32 %v6330_v58, 16 }
 0x1be   : > { %5067 = vmatmul.mubr.msk.bf16.vlgmr.msra.gmra.mrb[16].mxu0 %vm692_vm2, %v3573_v24  ;;  %v1973_v24 = vld [vmem:[#allocation2 + $0x70] sm:$0x3] }
 0x1bf   : > { %4917 = vmatmul.mubr.msk.bf16.gmra.mrb[28].mxu1 %vm692_vm2, %v1820_v17  ;;  %5083 = vmatpush3.bf16.msra.mxu0 %v6139_v8  ;;  %v1971_v8 = vld [vmem:[#allocation2 + $0x60] sm:$0xff]  ;;  %v2161_v17 = vshll.u32 %v6307_v15, 16  ;;  %v6371_v47 = vpack.c.bf16 %v1973_v24, %v1973_v24 }
 0x1c0   : > { %4922 = vmatprep.mubr.msk.bf16.mxu1 %vm692_vm2, %v6294_v29  ;;  %5070 = vmatprep.mubr.msk.bf16.mxu0 %vm692_vm2, %v3576_v31  ;;  %v6311_v9 = vpack.c.bf16 %v1972_v11, %v1971_v8  ;;  %v2153_v31 = vor.u32 %v2152_v37, %v2148_v5  ;;  %v6369_v11 = vpack.c.bf16 %v1987_v61, %v1986_v35  ;;  %v3732_v37 = vld [vmem:[#allocation2 + $0x100] sm:$0x3]  ;;  %v2192_v5 = vshrl.u32 %v6334_v4, 16  ;;  %v1985_v61 = vld [vmem:[#allocation2 + $0xd0] sm:$0x3] }
 0x1c1   : > { %5100 = vmatprep.subr.bf16.mxu0 %v6231_v36  ;;  %v2177_v51 = vshll.u32 %v6371_v47, 16  ;;  %v2205_v35 = vshll.u32 %v6347_v44, 16 }
 0x1c2   : > { %v2172_v50 = vshll.u32 %v6311_v9, 16  ;;  %v2158_v8 = vsel %vm840_vm4, %v2153_v31, %v2157_v34  ;;  %v2170_v39 = vshrl.u32 %v6311_v9, 16 }
 0x1c3   : > { %v2179_v27 = vrot.slane %v2177_v51, 1 }
 0x1c6   : > { %5071 = vmatmul.mubr.msk.bf16.gmra.mrb[20].mxu0 %vm692_vm2, %v3579_v49  ;;  %v2174_v49 = vrot.slane %v2172_v50, 1  ;;  %v6410_v50 = vpack.c.bf16 %v1982_v28, %v1982_v28  ;;  %v2225_v28 = vshrl.u32 %v6369_v11, 16 }
 0x1c7   : > { %4923 = vmatmul.mubr.msk.bf16.vlgmr.msra.gmra.mrb[16].mxu1 %vm692_vm2, %v6307_v15  ;;  %5074 = vmatprep.mubr.msk.bf16.mxu0 %vm692_vm2, %v3582_v33  ;;  %v2159_v33 = vshrl.u32 %v6307_v15, 16 }
 0x1c8   : > { %4926 = vmatprep.mubr.msk.bf16.mxu1 %vm692_vm2, %v6311_v9  ;;  %4939 = vmatpush3.bf16.msra.mxu1 %v6231_v36  ;;  %v2175_v41 = vor.u32 %v2174_v49, %v2170_v39  ;;  %v2207_v49 = vrot.slane %v2205_v35, 1  ;;  %v2210_v7 = vshll.u32 %v6410_v50, 16 }
 0x1c9   : > { %4956 = vmatprep.subr.bf16.mxu1 %v6316_v18 }
 0x1ca   : > { %v2180_v63 = vsel %vm840_vm4, %v2175_v41, %v2179_v27  ;;  %v3752_v41 = vld [vmem:[#allocation2 + $0x1a0] sm:$0xff]  ;;  %v2227_v27 = vshll.u32 %v6369_v11, 16 }
 0x1ce   : > { %5075 = vmatmul.mubr.msk.bf16.gmra.mrb[24].mxu0 %vm692_vm2, %v3585_v54  ;;  %v2194_v54 = vshll.u32 %v6334_v4, 16 }
 0x1cf   : > { %4927 = vmatmul.mubr.msk.bf16.gmra.mrb[20].mxu1 %vm692_vm2, %v6330_v58  ;;  %5078 = vmatprep.mubr.msk.bf16.mxu0 %vm692_vm2, %v3588_v40  ;;  %v2168_v40 = vrot.slane %v2166_v22, 1  ;;  %v1988_v22 = vld [vmem:[#allocation2 + $0xe8] sm:$0x3] }
 0x1d0   : > { %4930 = vmatprep.mubr.msk.bf16.mxu1 %vm692_vm2, %v6334_v4  ;;  %v2196_v12 = vrot.slane %v2194_v54, 1  ;;  %v2214_v54 = vshrl.u32 %v6354_v59, 16 }
 0x1d2   : > { %v2197_v24 = vor.u32 %v2196_v12, %v2192_v5 }
 0x1d6   : > { %5079 = vmatmul.mubr.msk.bf16.gmra.mrb[28].mxu0 %vm692_vm2, %v3591_v13  ;;  %v2188_v13 = vshll.u32 %v6389_v48, 16 }
 0x1d7   : > { %4931 = vmatmul.mubr.msk.bf16.gmra.mrb[24].mxu1 %vm692_vm2, %v6347_v44  ;;  %5084 = vmatprep.mubr.msk.bf16.mxu0 %vm692_vm2, %v5848_v3  ;;  %v2163_v3 = vrot.slane %v2161_v17, 1  ;;  %v2216_v17 = vshll.u32 %v6354_v59, 16 }
 0x1d8   : > { %4934 = vmatprep.mubr.msk.bf16.mxu1 %vm692_vm2, %v6354_v59  ;;  %v2190_v31 = vrot.slane %v2188_v13, 1 }
 0x1de   : > { %5085 = vmatmul.mubr.msk.bf16.vlgmr.msra.gmra.mrb[16].mxu0 %vm692_vm2, %v5861_v55  ;;  %v2164_v55 = vor.u32 %v2163_v3, %v2159_v33  ;;  %v6412_v3 = vpack.c.bf16 %v1985_v61, %v1985_v61  ;;  %v2218_v33 = vrot.slane %v2216_v17, 1 }
 0x1df   : > { %4935 = vmatmul.mubr.msk.bf16.gmra.mrb[28].mxu1 %vm692_vm2, %v6369_v11  ;;  %5101 = vmatpush3.bf16.msra.mxu0 %v6231_v36  ;;  %v1979_v36 = vld [vmem:[#allocation2 + $0xa0] sm:$0x3] }
 0x1e0   : > { %4940 = vmatprep.mubr.msk.bf16.mxu1 %vm692_vm2, %v2158_v8  ;;  %5088 = vmatprep.mubr.msk.bf16.mxu0 %vm692_vm2, %v5867_v62  ;;  %v6391_v21 = vpack.c.bf16 %v1979_v36, %v1979_v36  ;;  %v2169_v62 = vsel %vm840_vm4, %v2164_v55, %v2168_v40  ;;  %v2203_v55 = vshrl.u32 %v6347_v44, 16  ;;  %v3751_v36 = vld [vmem:[#allocation2 + $0x198] sm:$0xff]  ;;  %v6427_v40 = vpack.c.bf16 %v1988_v22, %v1988_v22 }
 0x1e1   : > { %5118 = vmatprep.subr.bf16.mxu0 %v6316_v18  ;;  %v6432_v12 = vpack.c.bf16 %v3752_v41, %v3751_v36 }
 0x1e2   : > { %v2199_v20 = vshll.u32 %v6391_v21, 16  ;;  %v2232_v35 = vshll.u32 %v6427_v40, 16 }
 0x1e4   : > { %v2201_v34 = vrot.slane %v2199_v20, 1  ;;  %v2234_v22 = vrot.slane %v2232_v35, 1 }
 0x1e6   : > { %5089 = vmatmul.mubr.msk.bf16.gmra.mrb[20].mxu0 %vm692_vm2, %v5888_v26  ;;  %v2186_v26 = vor.u32 %v2185_v25, %v2181_v45  ;;  %v2202_v39 = vsel %vm840_vm4, %v2197_v24, %v2201_v34  ;;  %v2208_v25 = vor.u32 %v2207_v49, %v2203_v55  ;;  %v2219_v45 = vor.u32 %v2218_v33, %v2214_v54  ;;  %v3741_v34 = vld [vmem:[#allocation2 + $0x148] sm:$0x3]  ;;  %v3744_v49 = vld [vmem:[#allocation2 + $0x160] sm:$0x3] }
 0x1e7   : > { %4941 = vmatmul.mubr.msk.bf16.vlgmr.msra.gmra.mrb[16].mxu1 %vm692_vm2, %v2169_v62  ;;  %5092 = vmatprep.mubr.msk.bf16.mxu0 %vm692_vm2, %v5900_v56  ;;  %v6408_v56 = vpack.c.bf16 %v3732_v37, %v3732_v37  ;;  %v3738_v62 = vld [vmem:[#allocation2 + $0x130] sm:$0x3]  ;;  %v2212_v37 = vrot.slane %v2210_v7, 1  ;;  %v2396_v55 = vrot.slane %v6349_v0, 1  ;;  %v6453_v7 = vpack.c.bf16 %v3744_v49, %v3744_v49 }
 0x1e8   : > { %4944 = vmatprep.mubr.msk.bf16.mxu1 %vm692_vm2, %v2180_v63  ;;  %4957 = vmatpush3.bf16.msra.mxu1 %v6316_v18  ;;  %v2191_v8 = vsel %vm840_vm4, %v2186_v26, %v2190_v31  ;;  %v6430_v63 = vpack.c.bf16 %v3735_v23, %v3735_v23  ;;  %v6434_v5 = vpack.c.bf16 %v3738_v62, %v3738_v62  ;;  %v2229_v26 = vrot.slane %v2227_v27, 1  ;;  %v3747_v27 = vld [vmem:[#allocation2 + $0x178] sm:$0x3]  ;;  %v3750_v62 = vld [vmem:[#allocation2 + $0x190] sm:$0x3] }
 0x1e9   : > { %v3914_v51 = vshll.u32 %v6408_v56, 16  ;;  %v2213_v61 = vsel %vm840_vm4, %v2208_v25, %v2212_v37  ;;  %v2395_v23 = vrot.slane %v6294_v29, 1  ;;  %v3958_v29 = vshll.u32 %v6453_v7, 16 }
 0x1ea   : > { %v3925_v17 = vshll.u32 %v6430_v63, 16  ;;  %v2230_v33 = vor.u32 %v2229_v26, %v2225_v28  ;;  %v2399_v25 = vrot.slane %v6367_v60, 1  ;;  %v6471_v37 = vpack.c.bf16 %v3747_v27, %v3747_v27 }
 0x1eb   : > { %v3916_v13 = vrot.slane %v3914_v51, 1  ;;  %v6449_v51 = vpack.c.bf16 %v3741_v34, %v3741_v34  ;;  %v6474_v28 = vpack.c.bf16 %v3750_v62, %v3750_v62  ;;  %v2407_v34 = vrot.slane %v6334_v4, 1  ;;  %v6553_v62 = vld [vmem:[%s6667_s6] ss:$0 sm:$0xff] }
 0x1ec   : > { %v2235_v36 = vsel %vm840_vm4, %v2230_v33, %v2234_v22 }
 0x1ed   : > { %v3917_v31 = vsel %vm840_vm4, %v5877_v14, %v3916_v13  ;;  %v3947_v54 = vshll.u32 %v6449_v51, 16 }
 0x1ee   : > { %5093 = vmatmul.mubr.msk.bf16.gmra.mrb[24].mxu0 %vm692_vm2, %v5911_v16  ;;  %v2221_v16 = vshll.u32 %v6412_v3, 16 }
 0x1ef   : > { %4945 = vmatmul.mubr.msk.bf16.gmra.mrb[20].mxu1 %vm692_vm2, %v2191_v8  ;;  %5096 = vmatprep.mubr.msk.bf16.mxu0 %vm692_vm2, %v6178_v2  ;;  %v3936_v8 = vshll.u32 %v6434_v5, 16  ;;  %v3949_v13 = vrot.slane %v3947_v54, 1 }
 0x1f0   : > { %4948 = vmatprep.mubr.msk.bf16.mxu1 %vm692_vm2, %v2202_v39  ;;  %v2223_v20 = vrot.slane %v2221_v16, 1  ;;  %v3927_v39 = vrot.slane %v3925_v17, 1  ;;  %v2397_v16 = vsel %vm1199_vm5, %v2395_v23, %v2396_v55  ;;  %v2404_v17 = vrot.slane %v6330_v58, 1 }
 0x1f1   : > { %v3938_v14 = vrot.slane %v3936_v8, 1  ;;  %v3950_v35 = vsel %vm840_vm4, %v5929_v32, %v3949_v13  ;;  %v3986_v32 = vshll.u32 %v6432_v12, 16  ;;  %v2408_v8 = vrot.slane %v6391_v21, 1 }
 0x1f2   : > { %v2224_v24 = vsel %vm840_vm4, %v2219_v45, %v2223_v20  ;;  %v3928_v41 = vsel %vm840_vm4, %v5898_v46, %v3927_v39  ;;  %v2398_v46 = vrot.slane %v6307_v15, 1  ;;  %v2401_v45 = vrot.slane %v6311_v9, 1 }
 0x1f3   : > { %v3939_v0 = vsel %vm840_vm4, %v5904_v1, %v3938_v14  ;;  %v2402_v20 = vrot.slane %v6371_v47, 1  ;;  %v3753_v1 = vld [vmem:[#allocation2 + $0x1a8] sm:$0x3]  ;;  %v3969_v15 = vshll.u32 %v6471_v37, 16  ;;  %v3980_v47 = vshll.u32 %v6474_v28, 16 }
 0x1f4   : > { %v2400_v26 = vsel %vm1199_vm5, %v2398_v46, %v2399_v25  ;;  %v3988_v33 = vrot.slane %v3986_v32, 1  ;;  %v2409_v58 = vsel %vm1199_vm5, %v2407_v34, %v2408_v8  ;;  %v2410_v55 = vrot.slane %v6347_v44, 1 }
 0x1f5   : > { %v2403_v9 = vsel %vm1199_vm5, %v2401_v45, %v2402_v20  ;;  %v3982_v49 = vrot.slane %v3980_v47, 1  ;;  %v2411_v14 = vrot.slane %v6410_v50, 1  ;;  %v4152_v50 = vrot.slane %v6430_v63, 1 }
 0x1f6   : > { %5097 = vmatmul.mubr.msk.bf16.gmra.mrb[28].mxu0 %vm692_vm2, %v6432_v12 }
 0x1f7   : > { %4949 = vmatmul.mubr.msk.bf16.gmra.mrb[24].mxu1 %vm692_vm2, %v2213_v61  ;;  %5102 = vmatprep.mubr.msk.bf16.mxu0 %vm692_vm2, %v3917_v31  ;;  %v3906_v61 = vpack.c.bf16 %v3753_v1, %v3753_v1  ;;  %v3971_v31 = vrot.slane %v3969_v15, 1  ;;  %v3983_v4 = vsel %vm840_vm4, %v6267_v52, %v3982_v49  ;;  %v2412_v52 = vsel %vm1199_vm5, %v2410_v55, %v2411_v14 }
 0x1f8   : > { %4952 = vmatprep.mubr.msk.bf16.mxu1 %vm692_vm2, %v2224_v24  ;;  %v2405_v24 = vrot.slane %v6389_v48, 1  ;;  %v4153_v27 = vsel %vm1199_vm5, %v6055_v10, %v4152_v50 }
 0x1f9   : > { %v3991_v22 = vshll.u32 %v3906_v61, 16  ;;  %v3972_v23 = vsel %vm840_vm4, %v5949_v6, %v3971_v31  ;;  %v2413_v6 = vrot.slane %v6354_v59, 1  ;;  %v2416_v59 = vrot.slane %v6369_v11, 1 }
 0x1fa   : > { %v2406_v39 = vsel %vm1199_vm5, %v2404_v17, %v2405_v24  ;;  %v4158_v11 = vrot.slane %v6449_v51, 1 }
 0x1fb   : > { %v3993_v21 = vrot.slane %v3991_v22, 1 }
 0x1fc   : > { %v4159_v63 = vsel %vm1199_vm5, %v6079_v19, %v4158_v11 }
 0x1fe   : > { %5103 = vmatmul.mubr.msk.bf16.vlgmr.msra.gmra.mrb[16].mxu0 %vm692_vm2, %v3928_v41  ;;  %v4149_v41 = vrot.slane %v6408_v56, 1  ;;  %v2417_v56 = vrot.slane %v6427_v40, 1  ;;  %v4161_v40 = vrot.slane %v6453_v7, 1  ;;  %v4169_v7 = vrot.slane %v6432_v12, 1 }
 0x1ff   : > { %4953 = vmatmul.mubr.msk.bf16.gmra.mrb[28].mxu1 %vm692_vm2, %v2235_v36  ;;  %5119 = vmatpush3.bf16.msra.mxu0 %v6316_v18  ;;  %v3960_v18 = vrot.slane %v3958_v29, 1  ;;  %v2414_v36 = vrot.slane %v6412_v3, 1  ;;  %v4155_v3 = vrot.slane %v6434_v5, 1  ;;  %v4164_v5 = vrot.slane %v6471_v37, 1 }
 0x200   : > { %4958 = vmatprep.mubr.msk.bf16.mxu1 %vm692_vm2, %v2397_v16  ;;  %5106 = vmatprep.mubr.msk.bf16.mxu0 %vm692_vm2, %v3939_v0  ;;  %v4150_v44 = vsel %vm1199_vm5, %v6036_v30, %v4149_v41  ;;  %v2418_v29 = vsel %vm1199_vm5, %v2416_v59, %v2417_v56  ;;  %v4162_v10 = vsel %vm1199_vm5, %v6084_v57, %v4161_v40  ;;  %v4170_v57 = vrot.slane %v3906_v61, 1 }
 0x201   : > { %v3961_v60 = vsel %vm840_vm4, %v5935_v38, %v3960_v18  ;;  %v3984_v38 = vshrl.u32 %v6432_v12, 16  ;;  %v2415_v16 = vsel %vm1199_vm5, %v2413_v6, %v2414_v36  ;;  %v4156_v30 = vsel %vm1199_vm5, %v6059_v53, %v4155_v3 }
 0x202   : > { %v4167_v53 = vrot.slane %v6474_v28, 1  ;;  %v4165_v51 = vsel %vm1199_vm5, %v6098_v42, %v4164_v5  ;;  %v4171_v0 = vsel %vm1199_vm5, %v4169_v7, %v4170_v57 }
 0x203   : > { %v3989_v48 = vor.u32 %v3988_v33, %v3984_v38 }
 0x204   : > { %v4168_v19 = vsel %vm1199_vm5, %v3589_v43, %v4167_v53 }
 0x205   : > { %v3994_v54 = vsel %vm840_vm4, %v3989_v48, %v3993_v21 }
 0x206   : > { %5107 = vmatmul.mubr.msk.bf16.gmra.mrb[20].mxu0 %vm692_vm2, %v3950_v35 }
 0x207   : > { %4959 = vmatmul.mubr.msk.bf16.vlgmr.msra.gmra.mrb[16].mxu1 %vm692_vm2, %v2400_v26  ;;  %5110 = vmatprep.mubr.msk.bf16.mxu0 %vm692_vm2, %v3961_v60 }
 0x208   : > { %4962 = vmatprep.mubr.msk.bf16.mxu1 %vm692_vm2, %v2403_v9 }
 0x20e   : > { %5111 = vmatmul.mubr.msk.bf16.gmra.mrb[24].mxu0 %vm692_vm2, %v3972_v23 }
 0x20f   : > { %4963 = vmatmul.mubr.msk.bf16.gmra.mrb[20].mxu1 %vm692_vm2, %v2406_v39  ;;  %5114 = vmatprep.mubr.msk.bf16.mxu0 %vm692_vm2, %v3983_v4 }
 0x210   : > { %4966 = vmatprep.mubr.msk.bf16.mxu1 %vm692_vm2, %v2409_v58 }
 0x216   : > { %5115 = vmatmul.mubr.msk.bf16.gmra.mrb[28].mxu0 %vm692_vm2, %v3994_v54 }
 0x217   : > { %4967 = vmatmul.mubr.msk.bf16.gmra.mrb[24].mxu1 %vm692_vm2, %v2412_v52  ;;  %5120 = vmatprep.mubr.msk.bf16.mxu0 %vm692_vm2, %v4150_v44 }
 0x218   : > { %4970 = vmatprep.mubr.msk.bf16.mxu1 %vm692_vm2, %v2415_v16 }
 0x21e   : > { %5121 = vmatmul.mubr.msk.bf16.vlgmr.msra.gmra.mrb[16].mxu0 %vm692_vm2, %v4153_v27 }
 0x21f   : > { %4971 = vmatmul.mubr.msk.bf16.gmra.mrb[28].mxu1 %vm692_vm2, %v2418_v29  ;;  %5124 = vmatprep.mubr.msk.bf16.mxu0 %vm692_vm2, %v4156_v30 }
 0x226   : > { %5125 = vmatmul.mubr.msk.bf16.gmra.mrb[20].mxu0 %vm692_vm2, %v4159_v63 }
 0x227   : > { %5128 = vmatprep.mubr.msk.bf16.mxu0 %vm692_vm2, %v4162_v10 }
 0x22e   : > { %5129 = vmatmul.mubr.msk.bf16.gmra.mrb[24].mxu0 %vm692_vm2, %v4165_v51 }
 0x22f   : > { %5132 = vmatprep.mubr.msk.bf16.mxu0 %vm692_vm2, %v4168_v19 }
 0x236   : > { %5133 = vmatmul.mubr.msk.bf16.gmra.mrb[28].mxu0 %vm692_vm2, %v4171_v0 }
 0x2da   : > { %v4960_v42 = vpop.f32.mrb[16].mxu1 }
 0x2db   : > { %v2570_v2 = vadd.f32 %v4960_v42, %v6553_v62  ;;  %v2483_v43 = vpop.f32.mrb[17].mxu1 }
 0x2dc   : > { %v2568_v12 = vadd.f32 %v6553_v62, %v2483_v43  ;;  %v4961_v46 = vpop.f32.mrb[18].mxu1 }
 0x2dd   : > { %2587 = vst.msk [vmem:[%s6560_s17 + $0x10] sm:$0xff] %vm2584_vm6, %v2570_v2  ;;  %v2571_v25 = vadd.f32 %v4961_v46, %v6553_v62  ;;  %v2486_v45 = vpop.f32.mrb[19].mxu1 }
 0x2de   : > { %2585 = vst.msk [vmem:[%s6560_s17] sm:$0xff] %vm2584_vm6, %v2568_v12  ;;  %v2569_v13 = vadd.f32 %v6553_v62, %v2486_v45 }
 0x2df   : > { %2588 = vst.msk [vmem:[%s6560_s17 + $0x18] sm:$0xff] %vm2584_vm6, %v2571_v25 }
 0x2e0   : > { %2586 = vst.msk [vmem:[%s6560_s17 + $0x8] sm:$0xff] %vm2584_vm6, %v2569_v13 }
 0x2e2   : > { %v4964_v37 = vpop.f32.mrb[20].mxu1 }
 0x2e3   : > { %v2574_v20 = vadd.f32 %v4964_v37, %v6553_v62  ;;  %v2499_v18 = vpop.f32.mrb[21].mxu1 }
 0x2e4   : > { %v2572_v28 = vadd.f32 %v6553_v62, %v2499_v18  ;;  %v4965_v26 = vpop.f32.mrb[22].mxu1 }
 0x2e5   : > { %2591 = vst.msk [vmem:[%s6560_s17 + $0x30] sm:$0xff] %vm2584_vm6, %v2574_v20  ;;  %v2575_v1 = vadd.f32 %v4965_v26, %v6553_v62  ;;  %v2502_v35 = vpop.f32.mrb[23].mxu1 }
 0x2e6   : > { %2589 = vst.msk [vmem:[%s6560_s17 + $0x20] sm:$0xff] %vm2584_vm6, %v2572_v28  ;;  %v2573_v15 = vadd.f32 %v6553_v62, %v2502_v35 }
 0x2e7   : > { %2592 = vst.msk [vmem:[%s6560_s17 + $0x38] sm:$0xff] %vm2584_vm6, %v2575_v1 }
 0x2e8   : > { %2590 = vst.msk [vmem:[%s6560_s17 + $0x28] sm:$0xff] %vm2584_vm6, %v2573_v15 }
 0x2ea   : > { %v4968_v9 = vpop.f32.mrb[24].mxu1 }
 0x2eb   : > { %v2578_v60 = vadd.f32 %v4968_v9, %v6553_v62  ;;  %v2515_v47 = vpop.f32.mrb[25].mxu1 }
 0x2ec   : > { %v2576_v61 = vadd.f32 %v6553_v62, %v2515_v47  ;;  %v4969_v32 = vpop.f32.mrb[26].mxu1 }
 0x2ed   : > { %2595 = vst.msk [vmem:[%s6560_s17 + $0x50] sm:$0xff] %vm2584_vm6, %v2578_v60  ;;  %v2579_v17 = vadd.f32 %v4969_v32, %v6553_v62  ;;  %v2518_v24 = vpop.f32.mrb[27].mxu1 }
 0x2ee   : > { %2593 = vst.msk [vmem:[%s6560_s17 + $0x40] sm:$0xff] %vm2584_vm6, %v2576_v61  ;;  %v2577_v31 = vadd.f32 %v6553_v62, %v2518_v24 }
 0x2ef   : > { %2596 = vst.msk [vmem:[%s6560_s17 + $0x58] sm:$0xff] %vm2584_vm6, %v2579_v17 }
 0x2f0   : > { %2594 = vst.msk [vmem:[%s6560_s17 + $0x48] sm:$0xff] %vm2584_vm6, %v2577_v31 }
 0x2f1   : > { %v5122_v8 = vpop.f32.mrb[16].mxu0 }
 0x2f2   : > { %v4972_v34 = vpop.f32.mrb[28].mxu1  ;;  %v4311_v38 = vadd.f32 %v5122_v8, %v6553_v62  ;;  %v4230_v22 = vpop.f32.mrb[17].mxu0 }
 0x2f3   : > { %v2582_v49 = vadd.f32 %v4972_v34, %v6553_v62  ;;  %v2531_v33 = vpop.f32.mrb[29].mxu1  ;;  %v4309_v23 = vadd.f32 %v6553_v62, %v4230_v22  ;;  %v5123_v4 = vpop.f32.mrb[18].mxu0 }
 0x2f4   : > { %v2580_v39 = vadd.f32 %v6553_v62, %v2531_v33  ;;  %v4973_v58 = vpop.f32.mrb[30].mxu1  ;;  %4581 = vst.msk [vmem:[%s6560_s17 + $0x90] sm:$0xff] %vm2584_vm6, %v4311_v38  ;;  %v4312_v21 = vadd.f32 %v5123_v4, %v6553_v62  ;;  %v4233_v14 = vpop.f32.mrb[19].mxu0 }
 0x2f5   : > { %2599 = vst.msk [vmem:[%s6560_s17 + $0x70] sm:$0xff] %vm2584_vm6, %v2582_v49  ;;  %v2583_v48 = vadd.f32 %v4973_v58, %v6553_v62  ;;  %v2534_v55 = vpop.f32.mrb[31].mxu1  ;;  %4579 = vst.msk [vmem:[%s6560_s17 + $0x80] sm:$0xff] %vm2584_vm6, %v4309_v23  ;;  %v4310_v36 = vadd.f32 %v6553_v62, %v4233_v14 }
 0x2f6   : > { %2597 = vst.msk [vmem:[%s6560_s17 + $0x60] sm:$0xff] %vm2584_vm6, %v2580_v39  ;;  %v2581_v6 = vadd.f32 %v6553_v62, %v2534_v55  ;;  %4582 = vst.msk [vmem:[%s6560_s17 + $0x98] sm:$0xff] %vm2584_vm6, %v4312_v21 }
 0x2f7   : > { %2600 = vst.msk [vmem:[%s6560_s17 + $0x78] sm:$0xff] %vm2584_vm6, %v2583_v48  ;;  %4580 = vst.msk [vmem:[%s6560_s17 + $0x88] sm:$0xff] %vm2584_vm6, %v4310_v36 }
 0x2f8   : > { %2598 = vst.msk [vmem:[%s6560_s17 + $0x68] sm:$0xff] %vm2584_vm6, %v2581_v6 }
 0x2f9   : > { %v5126_v41 = vpop.f32.mrb[20].mxu0 }
 0x2fa   : > { %v4315_v54 = vadd.f32 %v5126_v41, %v6553_v62  ;;  %v4246_v52 = vpop.f32.mrb[21].mxu0 }
 0x2fb   : > { %v4313_v16 = vadd.f32 %v6553_v62, %v4246_v52  ;;  %v5127_v44 = vpop.f32.mrb[22].mxu0 }
 0x2fc   : > { %4585 = vst.msk [vmem:[%s6560_s17 + $0xb0] sm:$0xff] %vm2584_vm6, %v4315_v54  ;;  %v4316_v59 = vadd.f32 %v5127_v44, %v6553_v62  ;;  %v4249_v56 = vpop.f32.mrb[23].mxu0 }
 0x2fd   : > { %4583 = vst.msk [vmem:[%s6560_s17 + $0xa0] sm:$0xff] %vm2584_vm6, %v4313_v16  ;;  %v4314_v50 = vadd.f32 %v6553_v62, %v4249_v56 }
 0x2fe   : > { %4586 = vst.msk [vmem:[%s6560_s17 + $0xb8] sm:$0xff] %vm2584_vm6, %v4316_v59 }
 0x2ff   : > { %4584 = vst.msk [vmem:[%s6560_s17 + $0xa8] sm:$0xff] %vm2584_vm6, %v4314_v50 }
 0x301   : > { %v5130_v3 = vpop.f32.mrb[24].mxu0 }
 0x302   : > { %v4319_v29 = vadd.f32 %v5130_v3, %v6553_v62  ;;  %v4262_v27 = vpop.f32.mrb[25].mxu0 }
 0x303   : > { %v4317_v30 = vadd.f32 %v6553_v62, %v4262_v27  ;;  %v5131_v11 = vpop.f32.mrb[26].mxu0 }
 0x304   : > { %4589 = vst.msk [vmem:[%s6560_s17 + $0xd0] sm:$0xff] %vm2584_vm6, %v4319_v29  ;;  %v4320_v40 = vadd.f32 %v5131_v11, %v6553_v62  ;;  %v4265_v63 = vpop.f32.mrb[27].mxu0 }
 0x305   : > { %4587 = vst.msk [vmem:[%s6560_s17 + $0xc0] sm:$0xff] %vm2584_vm6, %v4317_v30  ;;  %v4318_v10 = vadd.f32 %v6553_v62, %v4265_v63 }
 0x306   : > { %4590 = vst.msk [vmem:[%s6560_s17 + $0xd8] sm:$0xff] %vm2584_vm6, %v4320_v40 }
 0x307   : > { %4588 = vst.msk [vmem:[%s6560_s17 + $0xc8] sm:$0xff] %vm2584_vm6, %v4318_v10 }
 0x309   : > { %v5134_v5 = vpop.f32.mrb[28].mxu0 }
 0x30a   : > { %v4323_v53 = vadd.f32 %v5134_v5, %v6553_v62  ;;  %v4278_v51 = vpop.f32.mrb[29].mxu0 }
 0x30b   : > { %v4321_v19 = vadd.f32 %v6553_v62, %v4278_v51  ;;  %v5135_v7 = vpop.f32.mrb[30].mxu0 }
 0x30c   : > { %4593 = vst.msk [vmem:[%s6560_s17 + $0xf0] sm:$0xff] %vm2584_vm6, %v4323_v53  ;;  %v4324_v57 = vadd.f32 %v5135_v7, %v6553_v62  ;;  %v4281_v0 = vpop.f32.mrb[31].mxu0 }
 0x30d   : > { %4591 = vst.msk [vmem:[%s6560_s17 + $0xe0] sm:$0xff] %vm2584_vm6, %v4321_v19  ;;  %v4322_v42 = vadd.f32 %v6553_v62, %v4281_v0 }
 0x30e   : > { %4594 = vst.msk [vmem:[%s6560_s17 + $0xf8] sm:$0xff] %vm2584_vm6, %v4324_v57 }
 0x30f   : > { %4592 = vst.msk [vmem:[%s6560_s17 + $0xe8] sm:$0xff] %vm2584_vm6, %v4322_v42 }
 0x310 PF: > { %s17_s24 = sadd.s32 1, %s5420_s24  }
 0x311   : > { %p14_p4 = scmp.ge.s32.totalorder %s17_s24, 4  }
 0x313   :  { %16 = sbr.rel (!%p14_p4) target bundleno = 1 (0x1), region = 84 }

</bundles_post_ra>
